<compile_context>
chip_gen: v5e
topology: v5e:2x2
jax: 0.10.0
libtpu: 0.0.40
codegen_flags: <defaults>
</compile_context>

<pallas_src>
import functools

import jax
import jax.numpy as jnp
from jax.experimental import pallas as pl
from jax.experimental.pallas import tpu as pltpu


def bigan_fwd_kernel(x_ref,
                     we1_ref, be1_ref, we2_ref, be2_ref,
                     wg1_ref, bg1_ref, wg2_ref, bg2_ref,
                     z_ref, xrec_ref):
    """Fused E(x) then G(z) for one (TB, D_in) batch tile.

    x_ref    : (TB, D_in)   bf16 flattened input tile
    we1/be1  : (D_in, H) bf16, (1, H) f32        encoder layer 1
    we2/be2  : (H, Lp)  bf16, (1, Lp) f32        encoder layer 2 (-> latent z, Lp = padded latent)
    wg1/bg1  : (Lp, H)  bf16, (1, H) f32         generator layer 1
    wg2/bg2  : (H, D_in) bf16, (1, D_in) f32     generator layer 2 (-> x_rec, tanh)
    z_ref    : (TB, Lp)  f32 output latent (lane-dense, padded cols are zero)
    xrec_ref : (TB, D_in) f32 output reconstruction (flattened)
    """
    x = x_ref[...]  # bf16

    # ---- Encoder E ----
    h1 = jnp.dot(x, we1_ref[...], preferred_element_type=jnp.float32) + be1_ref[...]
    h1 = jnp.maximum(h1, 0.0)
    z = jnp.dot(h1.astype(jnp.bfloat16), we2_ref[...],
                preferred_element_type=jnp.float32) + be2_ref[...]
    z_ref[...] = z.astype(z_ref.dtype)

    # ---- Generator G ----
    h2 = jnp.dot(z.astype(jnp.bfloat16), wg1_ref[...],
                 preferred_element_type=jnp.float32) + bg1_ref[...]
    h2 = jnp.maximum(h2, 0.0)
    xr = jnp.dot(h2.astype(jnp.bfloat16), wg2_ref[...],
                 preferred_element_type=jnp.float32) + bg2_ref[...]
    xrec_ref[...] = jnp.tanh(xr).astype(xrec_ref.dtype)


@functools.partial(jax.jit, static_argnames=("latent", "tb"))
def bigan_forward(x_nchw, params, latent, tb=128):
    """Wrapper: NCHW -> flatten -> pad M to a full tile -> Pallas kernel -> unpad."""
    B, C, H, W = x_nchw.shape
    D_in = C * H * W
    hidden = params["we1"].shape[1]
    L_pad = params["we2"].shape[1]           # latent padded up to 128 lanes

    # Flatten, cast to bf16 for the MXU, zero-pad batch to a multiple of tb.
    x_flat = x_nchw.reshape(B, D_in).astype(jnp.bfloat16)
    B_pad = pl.cdiv(B, tb) * tb
    if B_pad != B:
        x_flat = jnp.pad(x_flat, ((0, B_pad - B), (0, 0)))

    grid = (B_pad // tb,)

    # x / outputs are tiled along the batch grid axis; weights stay resident.
    x_spec = pl.BlockSpec((tb, D_in), lambda i: (i, 0))
    w_spec = lambda shape: pl.BlockSpec(shape, lambda i: (0, 0))

    in_specs = [
        x_spec,
        w_spec(params["we1"].shape), w_spec(params["be1"].shape),
        w_spec(params["we2"].shape), w_spec(params["be2"].shape),
        w_spec(params["wg1"].shape), w_spec(params["bg1"].shape),
        w_spec(params["wg2"].shape), w_spec(params["bg2"].shape),
    ]
    out_specs = (
        pl.BlockSpec((tb, L_pad), lambda i: (i, 0)),
        pl.BlockSpec((tb, D_in), lambda i: (i, 0)),
    )

    # Advisory cost hint for XLA scheduling.
    flops = 2 * B_pad * (D_in * hidden + hidden * L_pad + L_pad * hidden + hidden * D_in)
    weight_bytes = sum(int(v.size) * v.dtype.itemsize for v in params.values())
    io_bytes = (x_flat.size * 2) + (B_pad * L_pad * 4) + (B_pad * D_in * 4)
    cost = pl.CostEstimate(flops=flops,
                           transcendentals=B_pad * D_in,
                           bytes_accessed=weight_bytes + io_bytes)

    z_pad, xrec_flat = pl.pallas_call(
        bigan_fwd_kernel,
        out_shape=(
            jax.ShapeDtypeStruct((B_pad, L_pad), jnp.float32),
            jax.ShapeDtypeStruct((B_pad, D_in), jnp.float32),
        ),
        grid=grid,
        in_specs=in_specs,
        out_specs=out_specs,
        compiler_params=pltpu.CompilerParams(
            dimension_semantics=("parallel",),
        ),
        cost_estimate=cost,
    )(
        x_flat,
        params["we1"], params["be1"], params["we2"], params["be2"],
        params["wg1"], params["bg1"], params["wg2"], params["bg2"],
    )

    z = z_pad[:B, :latent]
    x_rec = xrec_flat[:B].reshape(B, C, H, W)
    return z, x_rec


def init_params(key, d_in, hidden, latent, latent_pad=128):
    """Deterministic synthetic parameter init (PyTorch-Linear-style scaling).

    Weights are stored bf16 (MXU operands); biases stay f32 (VPU elementwise).
    Latent-sided weights/bias are zero-padded from `latent` to `latent_pad`
    columns/rows so the kernel's z path is lane-dense; zeros keep z exact.
    """
    ks = jax.random.split(key, 8)

    def lin(kw, kb, fan_in, fan_out):
        bound = 1.0 / jnp.sqrt(float(fan_in))
        w = jax.random.uniform(kw, (fan_in, fan_out), jnp.float32, -bound, bound)
        b = jax.random.uniform(kb, (1, fan_out), jnp.float32, -bound, bound)
        return w, b

    we1, be1 = lin(ks[0], ks[1], d_in, hidden)
    we2, be2 = lin(ks[2], ks[3], hidden, latent)
    wg1, bg1 = lin(ks[4], ks[5], latent, hidden)
    wg2, bg2 = lin(ks[6], ks[7], hidden, d_in)

    # Zero-pad the latent dimension to latent_pad (lane-dense z, full-width MXU tiles).
    pad_l = latent_pad - latent
    we2 = jnp.pad(we2, ((0, 0), (0, pad_l)))
    be2 = jnp.pad(be2, ((0, 0), (0, pad_l)))
    wg1 = jnp.pad(wg1, ((0, pad_l), (0, 0)))

    bf = jnp.bfloat16
    return {
        "we1": we1.astype(bf), "be1": be1,
        "we2": we2.astype(bf), "be2": be2,
        "wg1": wg1.astype(bf), "bg1": bg1,
        "wg2": wg2.astype(bf), "bg2": bg2,
    }


if __name__ == "__main__":
    # Small shapes consistent with the module's forward (mode=None).
    B, C, H, W = 2, 4, 16, 16
    latent_dim = 32
    hidden = 128
    d_in = C * H * W

    key = jax.random.PRNGKey(0)
    k_x, k_p = jax.random.split(key)

    x = jax.random.normal(k_x, (B, C, H, W), dtype=jnp.float32)
    params = init_params(k_p, d_in, hidden, latent_dim, latent_pad=128)

    z, x_rec = bigan_forward(x, params, latent_dim)
    jax.block_until_ready((z, x_rec))

    assert z.shape == (B, latent_dim)
    assert x_rec.shape == (B, C, H, W)

    # Pure-JAX reference emulating the same bf16-operand / f32-accumulate path.
    xf = x.reshape(B, d_in).astype(jnp.bfloat16)
    f32 = jnp.float32
    h1 = jnp.maximum(
        jnp.dot(xf, params["we1"], preferred_element_type=f32) + params["be1"], 0.0)
    z_full = jnp.dot(h1.astype(jnp.bfloat16), params["we2"],
                     preferred_element_type=f32) + params["be2"]
    h2 = jnp.maximum(
        jnp.dot(z_full.astype(jnp.bfloat16), params["wg1"],
                preferred_element_type=f32) + params["bg1"], 0.0)
    xr_ref = jnp.tanh(
        jnp.dot(h2.astype(jnp.bfloat16), params["wg2"],
                preferred_element_type=f32) + params["bg2"]).reshape(B, C, H, W)
    z_ref = z_full[:, :latent_dim]

    assert jnp.allclose(z, z_ref, atol=1e-2, rtol=1e-2)
    assert jnp.allclose(x_rec, xr_ref, atol=1e-2, rtol=1e-2)

    # TODO(synk): training-time methods (objective/fit, discriminator D, sample_prior
    # losses) are optimizer-driven and out of scope for a forward-pass kernel.
    print("KERNEL_OK")
</pallas_src>

<mosaic_0001>
module attributes {stable_mosaic.version = 11 : i64} {
  func.func @bigan_fwd_kernel(%arg0: i32, %arg1: memref<128x1024xbf16, #tpu.memory_space<vmem>>, %arg2: memref<1024x128xbf16, #tpu.memory_space<vmem>>, %arg3: memref<1x128xf32, #tpu.memory_space<vmem>>, %arg4: memref<128x128xbf16, #tpu.memory_space<vmem>>, %arg5: memref<1x128xf32, #tpu.memory_space<vmem>>, %arg6: memref<128x128xbf16, #tpu.memory_space<vmem>>, %arg7: memref<1x128xf32, #tpu.memory_space<vmem>>, %arg8: memref<128x1024xbf16, #tpu.memory_space<vmem>>, %arg9: memref<1x1024xf32, #tpu.memory_space<vmem>>, %arg10: memref<128x128xf32, #tpu.memory_space<vmem>>, %arg11: memref<128x1024xf32, #tpu.memory_space<vmem>>) attributes {dimension_semantics = [#tpu.dimension_semantics<parallel>], iteration_bounds = array<i64: 1>, scalar_prefetch = 0 : i64, scratch_operands = 0 : i64, tpu.core_type = #tpu.core_type<tc>, window_params = [{transform_indices = @transform_0, window_bounds = array<i64: 128, 1024>}, {pipeline_mode = #tpu.pipeline_mode<synchronous>, transform_indices = @transform_1, window_bounds = array<i64: 1024, 128>}, {pipeline_mode = #tpu.pipeline_mode<synchronous>, transform_indices = @transform_2, window_bounds = array<i64: 1, 128>}, {pipeline_mode = #tpu.pipeline_mode<synchronous>, transform_indices = @transform_3, window_bounds = array<i64: 128, 128>}, {pipeline_mode = #tpu.pipeline_mode<synchronous>, transform_indices = @transform_4, window_bounds = array<i64: 1, 128>}, {pipeline_mode = #tpu.pipeline_mode<synchronous>, transform_indices = @transform_5, window_bounds = array<i64: 128, 128>}, {pipeline_mode = #tpu.pipeline_mode<synchronous>, transform_indices = @transform_6, window_bounds = array<i64: 1, 128>}, {pipeline_mode = #tpu.pipeline_mode<synchronous>, transform_indices = @transform_7, window_bounds = array<i64: 128, 1024>}, {pipeline_mode = #tpu.pipeline_mode<synchronous>, transform_indices = @transform_8, window_bounds = array<i64: 1, 1024>}, {transform_indices = @transform_9, window_bounds = array<i64: 128, 128>}, {transform_indices = @transform_10, window_bounds = array<i64: 128, 1024>}]} {
    %c0 = arith.constant 0 : index
    %c0_0 = arith.constant 0 : index
    %0 = vector.load %arg1[%c0, %c0_0] : memref<128x1024xbf16, #tpu.memory_space<vmem>>, vector<128x1024xbf16>
    %c0_1 = arith.constant 0 : index
    %c0_2 = arith.constant 0 : index
    %1 = vector.load %arg2[%c0_1, %c0_2] : memref<1024x128xbf16, #tpu.memory_space<vmem>>, vector<1024x128xbf16>
    %cst = arith.constant dense<0.000000e+00> : vector<128x128xf32>
    %2 = tpu.matmul %0, %1, %cst {dimension_numbers = #tpu.dot_dimension_numbers<[1], [0], [0], [1], [0, 0, 1, 1], [], []>} : vector<128x1024xbf16>, vector<1024x128xbf16>, vector<128x128xf32> -> vector<128x128xf32>
    %c0_3 = arith.constant 0 : index
    %c0_4 = arith.constant 0 : index
    %3 = vector.load %arg3[%c0_3, %c0_4] : memref<1x128xf32, #tpu.memory_space<vmem>>, vector<1x128xf32>
    %4 = vector.broadcast %3 : vector<1x128xf32> to vector<128x128xf32>
    %5 = arith.addf %2, %4 : vector<128x128xf32>
    %cst_5 = arith.constant 0.000000e+00 : f32
    %6 = vector.broadcast %cst_5 : f32 to vector<128x128xf32>
    %7 = arith.maximumf %5, %6 : vector<128x128xf32>
    %8 = arith.truncf %7 : vector<128x128xf32> to vector<128x128xbf16>
    %c0_6 = arith.constant 0 : index
    %c0_7 = arith.constant 0 : index
    %9 = vector.load %arg4[%c0_6, %c0_7] : memref<128x128xbf16, #tpu.memory_space<vmem>>, vector<128x128xbf16>
    %cst_8 = arith.constant dense<0.000000e+00> : vector<128x128xf32>
    %10 = tpu.matmul %8, %9, %cst_8 {dimension_numbers = #tpu.dot_dimension_numbers<[1], [0], [0], [1], [0, 0, 1, 1], [], []>} : vector<128x128xbf16>, vector<128x128xbf16>, vector<128x128xf32> -> vector<128x128xf32>
    %c0_9 = arith.constant 0 : index
    %c0_10 = arith.constant 0 : index
    %11 = vector.load %arg5[%c0_9, %c0_10] : memref<1x128xf32, #tpu.memory_space<vmem>>, vector<1x128xf32>
    %12 = vector.broadcast %11 : vector<1x128xf32> to vector<128x128xf32>
    %13 = arith.addf %10, %12 : vector<128x128xf32>
    %c0_11 = arith.constant 0 : index
    %c0_12 = arith.constant 0 : index
    %14 = vector.load %arg10[%c0_11, %c0_12] : memref<128x128xf32, #tpu.memory_space<vmem>>, vector<128x128xf32>
    tpu.vector_store %arg10[%c0_11, %c0_12], %13 {strides = array<i32>} : memref<128x128xf32, #tpu.memory_space<vmem>>, vector<128x128xf32>,
    %15 = arith.truncf %13 : vector<128x128xf32> to vector<128x128xbf16>
    %c0_13 = arith.constant 0 : index
    %c0_14 = arith.constant 0 : index
    %16 = vector.load %arg6[%c0_13, %c0_14] : memref<128x128xbf16, #tpu.memory_space<vmem>>, vector<128x128xbf16>
    %cst_15 = arith.constant dense<0.000000e+00> : vector<128x128xf32>
    %17 = tpu.matmul %15, %16, %cst_15 {dimension_numbers = #tpu.dot_dimension_numbers<[1], [0], [0], [1], [0, 0, 1, 1], [], []>} : vector<128x128xbf16>, vector<128x128xbf16>, vector<128x128xf32> -> vector<128x128xf32>
    %c0_16 = arith.constant 0 : index
    %c0_17 = arith.constant 0 : index
    %18 = vector.load %arg7[%c0_16, %c0_17] : memref<1x128xf32, #tpu.memory_space<vmem>>, vector<1x128xf32>
    %19 = vector.broadcast %18 : vector<1x128xf32> to vector<128x128xf32>
    %20 = arith.addf %17, %19 : vector<128x128xf32>
    %cst_18 = arith.constant 0.000000e+00 : f32
    %21 = vector.broadcast %cst_18 : f32 to vector<128x128xf32>
    %22 = arith.maximumf %20, %21 : vector<128x128xf32>
    %23 = arith.truncf %22 : vector<128x128xf32> to vector<128x128xbf16>
    %c0_19 = arith.constant 0 : index
    %c0_20 = arith.constant 0 : index
    %24 = vector.load %arg8[%c0_19, %c0_20] : memref<128x1024xbf16, #tpu.memory_space<vmem>>, vector<128x1024xbf16>
    %cst_21 = arith.constant dense<0.000000e+00> : vector<128x1024xf32>
    %25 = tpu.matmul %23, %24, %cst_21 {dimension_numbers = #tpu.dot_dimension_numbers<[1], [0], [0], [1], [0, 0, 1, 1], [], []>} : vector<128x128xbf16>, vector<128x1024xbf16>, vector<128x1024xf32> -> vector<128x1024xf32>
    %c0_22 = arith.constant 0 : index
    %c0_23 = arith.constant 0 : index
    %26 = vector.load %arg9[%c0_22, %c0_23] : memref<1x1024xf32, #tpu.memory_space<vmem>>, vector<1x1024xf32>
    %27 = vector.broadcast %26 : vector<1x1024xf32> to vector<128x1024xf32>
    %28 = arith.addf %25, %27 : vector<128x1024xf32>
    %29 = math.tanh %28 : vector<128x1024xf32>
    %c0_24 = arith.constant 0 : index
    %c0_25 = arith.constant 0 : index
    %30 = vector.load %arg11[%c0_24, %c0_25] : memref<128x1024xf32, #tpu.memory_space<vmem>>, vector<128x1024xf32>
    tpu.vector_store %arg11[%c0_24, %c0_25], %29 {strides = array<i32>} : memref<128x1024xf32, #tpu.memory_space<vmem>>, vector<128x1024xf32>,
    return
  }
  func.func @transform_0(%arg0: i32) -> (i32, i32) {
    %c0_i32 = arith.constant 0 : i32
    %c0_i32_0 = arith.constant 0 : i32
    return %arg0, %c0_i32 : i32, i32
  }
  func.func @transform_1(%arg0: i32) -> (i32, i32) {
    %c0_i32 = arith.constant 0 : i32
    %c0_i32_0 = arith.constant 0 : i32
    %c0_i32_1 = arith.constant 0 : i32
    return %c0_i32, %c0_i32_0 : i32, i32
  }
  func.func @transform_2(%arg0: i32) -> (i32, i32) {
    %c0_i32 = arith.constant 0 : i32
    %c0_i32_0 = arith.constant 0 : i32
    %c0_i32_1 = arith.constant 0 : i32
    return %c0_i32, %c0_i32_0 : i32, i32
  }
  func.func @transform_3(%arg0: i32) -> (i32, i32) {
    %c0_i32 = arith.constant 0 : i32
    %c0_i32_0 = arith.constant 0 : i32
    %c0_i32_1 = arith.constant 0 : i32
    return %c0_i32, %c0_i32_0 : i32, i32
  }
  func.func @transform_4(%arg0: i32) -> (i32, i32) {
    %c0_i32 = arith.constant 0 : i32
    %c0_i32_0 = arith.constant 0 : i32
    %c0_i32_1 = arith.constant 0 : i32
    return %c0_i32, %c0_i32_0 : i32, i32
  }
  func.func @transform_5(%arg0: i32) -> (i32, i32) {
    %c0_i32 = arith.constant 0 : i32
    %c0_i32_0 = arith.constant 0 : i32
    %c0_i32_1 = arith.constant 0 : i32
    return %c0_i32, %c0_i32_0 : i32, i32
  }
  func.func @transform_6(%arg0: i32) -> (i32, i32) {
    %c0_i32 = arith.constant 0 : i32
    %c0_i32_0 = arith.constant 0 : i32
    %c0_i32_1 = arith.constant 0 : i32
    return %c0_i32, %c0_i32_0 : i32, i32
  }
  func.func @transform_7(%arg0: i32) -> (i32, i32) {
    %c0_i32 = arith.constant 0 : i32
    %c0_i32_0 = arith.constant 0 : i32
    %c0_i32_1 = arith.constant 0 : i32
    return %c0_i32, %c0_i32_0 : i32, i32
  }
  func.func @transform_8(%arg0: i32) -> (i32, i32) {
    %c0_i32 = arith.constant 0 : i32
    %c0_i32_0 = arith.constant 0 : i32
    %c0_i32_1 = arith.constant 0 : i32
    return %c0_i32, %c0_i32_0 : i32, i32
  }
  func.func @transform_9(%arg0: i32) -> (i32, i32) {
    %c0_i32 = arith.constant 0 : i32
    %c0_i32_0 = arith.constant 0 : i32
    return %arg0, %c0_i32 : i32, i32
  }
  func.func @transform_10(%arg0: i32) -> (i32, i32) {
    %c0_i32 = arith.constant 0 : i32
    %c0_i32_0 = arith.constant 0 : i32
    return %arg0, %c0_i32 : i32, i32
  }
}

</mosaic_0001>

<bundles_post_ra>
// kernel: bigan_forward.1
= control target key start
LH: loop header
LB: loop body
LE: loop exit
PB: predicated region body
PF: predicated region fallthrough
CT: control target
= control target key end

     0   :  { %16 = vsyncpa [#allocation3], 0  ;;  %s4051_s16 = smov [#allocation2]   ;;  %s4052_s18 = smov 512   ;;  %s5582_s0 = inlined_call_operand.vmem [shape: bf16[128,1024], index: 0, kind: input, shape index: {}]   ;;  %s5583_s1 = inlined_call_operand.vmem [shape: bf16[1024,128], index: 1, kind: input, shape index: {}]   ;;  %s5584_s2 = inlined_call_operand.vmem [shape: f32[1,128], index: 2, kind: input, shape index: {}]   ;;  %s5585_s3 = inlined_call_operand.vmem [shape: bf16[128,128], index: 3, kind: input, shape index: {}]   ;;  %s5586_s4 = inlined_call_operand.vmem [shape: f32[1,128], index: 4, kind: input, shape index: {}]   ;;  %s5587_s5 = inlined_call_operand.vmem [shape: bf16[128,128], index: 5, kind: input, shape index: {}]   ;;  %s5588_s6 = inlined_call_operand.vmem [shape: f32[1,128], index: 6, kind: input, shape index: {}]   ;;  %s5589_s7 = inlined_call_operand.hbm [shape: bf16[128,1024], index: 7, kind: input, shape index: {}]   ;;  %s5590_s8 = inlined_call_operand.vmem [shape: f32[1,1024], index: 8, kind: input, shape index: {}]   ;;  %s5591_s9 = inlined_call_operand.vmem [shape: f32[128,128], index: 9, kind: output, shape index: {0}]   ;;  %s5592_s10 = inlined_call_operand.vmem [shape: f32[128,1024], index: 10, kind: output, shape index: {1}]  }
   0x1   :  { %s35_s15 = sshll.u32 %s5589_s7, 4  ;;  %s37_s17 = sshll.u32 %s4051_s16, 4  ;;  %s36_s15 = int_to_ptr.hbm [resolvable:$true] %s35_s15  ;;  %s38_s17 = int_to_ptr.vmem [resolvable:$true] %s37_s17 }
   0x2   :  { %s4053_s19 = smov 32  }
   0x3   :  { %43 = dma.hbm_to_vmem [thread:$0]  %s36_s15, 8192, %s38_s17, [#allocation3], %s4052_s18, %s4052_s18, %s4053_s19  }
   0x4   :  { %4049 = dma.done.wait [#allocation3], 8192  }
   0x5   :  { %4050 = vsyncadd [#allocation3], 4294959104  ;;  %v3610_v0 = vld [vmem:[%s5583_s1 + $0x38] sm:$0xff]  ;;  %v3609_v2 = vld [vmem:[%s5583_s1 + $0x30] sm:$0xff] }
   0x6   :  { %v3618_v1 = vld [vmem:[%s5583_s1 + $0x78] sm:$0xff]  ;;  %3747 = vmatpush.bf16.msra.mxu2 %v3610_v0  ;;  %v3617_v3 = vld [vmem:[%s5583_s1 + $0x70] sm:$0xff]  ;;  %950 = vmatpush.bf16.msra.mxu0 %v3610_v0  ;;  %v3608_v4 = vld [vmem:[%s5583_s1 + $0x28] sm:$0xff] }
   0x7   :  { %3755 = vmatpush.bf16.msra.mxu3 %v3618_v1  ;;  %999 = vmatpush.bf16.msra.mxu1 %v3618_v1  ;;  %v3616_v5 = vld [vmem:[%s5583_s1 + $0x68] sm:$0xff]  ;;  %v3607_v6 = vld [vmem:[%s5583_s1 + $0x20] sm:$0xff]  ;;  %v3606_v8 = vld [vmem:[%s5583_s1 + $0x18] sm:$0xff] }
   0x8   :  { %v3615_v7 = vld [vmem:[%s5583_s1 + $0x60] sm:$0xff]  ;;  %v3614_v9 = vld [vmem:[%s5583_s1 + $0x58] sm:$0xff]  ;;  %v3605_v10 = vld [vmem:[%s5583_s1 + $0x10] sm:$0xff] }
   0x9   :  { %v3613_v11 = vld [vmem:[%s5583_s1 + $0x50] sm:$0xff]  ;;  %v3604_v12 = vld [vmem:[%s5583_s1 + $0x8] sm:$0xff]  ;;  %v3603_v14 = vld [vmem:[%s5583_s1] sm:$0xff] }
   0xa   :  { %3748 = vmatpush.bf16.msra.mxu2 %v3609_v2  ;;  %951 = vmatpush.bf16.msra.mxu0 %v3609_v2  ;;  %v3612_v13 = vld [vmem:[%s5583_s1 + $0x48] sm:$0xff]  ;;  %v3611_v15 = vld [vmem:[%s5583_s1 + $0x40] sm:$0xff]  ;;  %v3626_v20 = vld [vmem:[%s5583_s1 + $0xb8] sm:$0xff] }
   0xb   :  { %3756 = vmatpush.bf16.msra.mxu3 %v3617_v3  ;;  %1000 = vmatpush.bf16.msra.mxu1 %v3617_v3  ;;  %v2837_v16 = vld [vmem:[%s5582_s0 + $0x100] sm:$0xf]  ;;  %v3571_v18 = vld [vmem:[%s5582_s0 + $0x104] sm:$0xf]  ;;  %v3634_v21 = vld [vmem:[%s5583_s1 + $0xf8] sm:$0xff] }
   0xc   :  { %v3575_v17 = vld [vmem:[%s5582_s0 + $0x11c] sm:$0xf0]  ;;  %v2839_v19 = vld [vmem:[%s5582_s0 + $0x120] sm:$0xf0]  ;;  %v3625_v28 = vld [vmem:[%s5583_s1 + $0xb0] sm:$0xff] }
   0xd   :  { %v2709_v22 = vld [vmem:[%s5582_s0] sm:$0xf]  ;;  %v2838_v24 = vor.u32 %v3575_v17, %v2837_v16  ;;  %v2842_v25 = vor.u32 %v3571_v18, %v2839_v19  ;;  %v3539_v26 = vld [vmem:[%s5582_s0 + $0x4] sm:$0xf]  ;;  %v3633_v30 = vld [vmem:[%s5583_s1 + $0xf0] sm:$0xff] }
   0xe   :  { %3749 = vmatpush.bf16.msra.mxu2 %v3608_v4  ;;  %952 = vmatpush.bf16.msra.mxu0 %v3608_v4  ;;  %v3543_v23 = vld [vmem:[%s5582_s0 + $0x1c] sm:$0xf0]  ;;  %v2711_v27 = vld [vmem:[%s5582_s0 + $0x20] sm:$0xf0]  ;;  %v3624_v32 = vld [vmem:[%s5583_s1 + $0xa8] sm:$0xff] }
   0xf   :  { %3757 = vmatpush.bf16.msra.mxu3 %v3616_v5  ;;  %1001 = vmatpush.bf16.msra.mxu1 %v3616_v5  ;;  %v2710_v29 = vor.u32 %v3543_v23, %v2709_v22  ;;  %v2714_v31 = vor.u32 %v3539_v26, %v2711_v27  ;;  %v3642_v33 = vld [vmem:[%s5583_s1 + $0x138] sm:$0xff]  ;;  %v3632_v34 = vld [vmem:[%s5583_s1 + $0xe8] sm:$0xff]  ;;  %v3641_v36 = vld [vmem:[%s5583_s1 + $0x130] sm:$0xff] }
  0x10   :  { %v3650_v35 = vld [vmem:[%s5583_s1 + $0x178] sm:$0xff]  ;;  %v3623_v37 = vld [vmem:[%s5583_s1 + $0xa0] sm:$0xff]  ;;  %v3621_v52 = vld [vmem:[%s5583_s1 + $0x90] sm:$0xff] }
  0x11   :  { %v3631_v38 = vld [vmem:[%s5583_s1 + $0xe0] sm:$0xff]  ;;  %v3622_v43 = vld [vmem:[%s5583_s1 + $0x98] sm:$0xff]  ;;  %v3629_v54 = vld [vmem:[%s5583_s1 + $0xd0] sm:$0xff] }
  0x12   :  { %3750 = vmatpush.bf16.msra.mxu2 %v3607_v6  ;;  %953 = vmatpush.bf16.msra.mxu0 %v3607_v6  ;;  %v2869_v39 = vld [vmem:[%s5582_s0 + $0x140] sm:$0xf]  ;;  %v3579_v41 = vld [vmem:[%s5582_s0 + $0x144] sm:$0xf]  ;;  %v3630_v46 = vld [vmem:[%s5583_s1 + $0xd8] sm:$0xff] }
  0x13   :  { %3758 = vmatpush.bf16.msra.mxu3 %v3615_v7  ;;  %1002 = vmatpush.bf16.msra.mxu1 %v3615_v7  ;;  %v3583_v40 = vld [vmem:[%s5582_s0 + $0x15c] sm:$0xf0]  ;;  %v2871_v42 = vld [vmem:[%s5582_s0 + $0x160] sm:$0xf0]  ;;  %v3649_v55 = vld [vmem:[%s5583_s1 + $0x170] sm:$0xff] }
  0x14   :  { %v2741_v44 = vld [vmem:[%s5582_s0 + $0x40] sm:$0xf]  ;;  %v2870_v47 = vor.u32 %v3583_v40, %v2869_v39  ;;  %v2874_v48 = vor.u32 %v3579_v41, %v2871_v42  ;;  %v3547_v49 = vld [vmem:[%s5582_s0 + $0x44] sm:$0xf]  ;;  %v3640_v56 = vld [vmem:[%s5583_s1 + $0x128] sm:$0xff] }
  0x15   :  { %v3551_v45 = vld [vmem:[%s5582_s0 + $0x5c] sm:$0xf0]  ;;  %v2743_v50 = vld [vmem:[%s5582_s0 + $0x60] sm:$0xf0]  ;;  %v3648_v57 = vld [vmem:[%s5583_s1 + $0x168] sm:$0xff] }
  0x16   :  { %3751 = vmatpush.bf16.msra.mxu2 %v3606_v8  ;;  %954 = vmatpush.bf16.msra.mxu0 %v3606_v8  ;;  %v2742_v51 = vor.u32 %v3551_v45, %v2741_v44  ;;  %v2746_v53 = vor.u32 %v3547_v49, %v2743_v50  ;;  %v3620_v58 = vld [vmem:[%s5583_s1 + $0x88] sm:$0xff]  ;;  %v3639_v60 = vld [vmem:[%s5583_s1 + $0x120] sm:$0xff]  ;;  %v3638_v2 = vld [vmem:[%s5583_s1 + $0x118] sm:$0xff] }
  0x17   :  { %3759 = vmatpush.bf16.msra.mxu3 %v3614_v9  ;;  %1003 = vmatpush.bf16.msra.mxu1 %v3614_v9  ;;  %v3628_v59 = vld [vmem:[%s5583_s1 + $0xc8] sm:$0xff]  ;;  %v3647_v61 = vld [vmem:[%s5583_s1 + $0x160] sm:$0xff]  ;;  %v3646_v5 = vld [vmem:[%s5583_s1 + $0x158] sm:$0xff] }
  0x18   :  { %v3619_v62 = vld [vmem:[%s5583_s1 + $0x80] sm:$0xff]  ;;  %v3658_v16 = vld [vmem:[%s5583_s1 + $0x1b8] sm:$0xff]  ;;  %v3636_v18 = vld [vmem:[%s5583_s1 + $0x108] sm:$0xff] }
  0x19   :  { %v3627_v63 = vld [vmem:[%s5583_s1 + $0xc0] sm:$0xff]  ;;  %v3666_v17 = vld [vmem:[%s5583_s1 + $0x1f8] sm:$0xff]  ;;  %v3644_v19 = vld [vmem:[%s5583_s1 + $0x148] sm:$0xff] }
  0x1a   :  { %3752 = vmatpush.bf16.msra.mxu2 %v3605_v10  ;;  %955 = vmatpush.bf16.msra.mxu0 %v3605_v10  ;;  %v2901_v0 = vld [vmem:[%s5582_s0 + $0x180] sm:$0xf]  ;;  %v3587_v3 = vld [vmem:[%s5582_s0 + $0x184] sm:$0xf]  ;;  %v2719_v39 = vld [vmem:[%s5582_s0 + $0x28] sm:$0xf0] }
  0x1b   :  { %3760 = vmatpush.bf16.msra.mxu3 %v3613_v11  ;;  %1004 = vmatpush.bf16.msra.mxu1 %v3613_v11  ;;  %v3591_v1 = vld [vmem:[%s5582_s0 + $0x19c] sm:$0xf0]  ;;  %v2903_v4 = vld [vmem:[%s5582_s0 + $0x1a0] sm:$0xf0]  ;;  %v2725_v40 = vld [vmem:[%s5582_s0 + $0x10] sm:$0xf] }
  0x1c   :  { %v2773_v6 = vld [vmem:[%s5582_s0 + $0x80] sm:$0xf]  ;;  %v2902_v8 = vor.u32 %v3591_v1, %v2901_v0  ;;  %v2906_v9 = vor.u32 %v3587_v3, %v2903_v4  ;;  %v3555_v10 = vld [vmem:[%s5582_s0 + $0x84] sm:$0xf]  ;;  %v3545_v41 = vld [vmem:[%s5582_s0 + $0x2c] sm:$0xf0] }
  0x1d   :  { %v3559_v7 = vld [vmem:[%s5582_s0 + $0x9c] sm:$0xf0]  ;;  %v2775_v11 = vld [vmem:[%s5582_s0 + $0xa0] sm:$0xf0]  ;;  %v3541_v44 = vld [vmem:[%s5582_s0 + $0x14] sm:$0xf] }
  0x1e   :  { %3753 = vmatpush.bf16.msra.mxu2 %v3604_v12  ;;  %956 = vmatpush.bf16.msra.mxu0 %v3604_v12  ;;  %v3637_v12 = vld [vmem:[%s5583_s1 + $0x110] sm:$0xff]  ;;  %v2933_v22 = vld [vmem:[%s5582_s0 + $0x1c0] sm:$0xf]  ;;  %v3664_v49 = vld [vmem:[%s5583_s1 + $0x1e8] sm:$0xff] }
  0x1f   :  { %3761 = vmatpush.bf16.msra.mxu3 %v3612_v13  ;;  %1005 = vmatpush.bf16.msra.mxu1 %v3612_v13  ;;  %v2774_v13 = vor.u32 %v3559_v7, %v2773_v6  ;;  %v3599_v23 = vld [vmem:[%s5582_s0 + $0x1dc] sm:$0xf0]  ;;  %v2727_v45 = vld [vmem:[%s5582_s0 + $0x30] sm:$0xf0]  ;;  %v2749_v50 = vld [vmem:[%s5582_s0 + $0x48] sm:$0xf] }
  0x20   :  { %v2805_v26 = vld [vmem:[%s5582_s0 + $0xc0] sm:$0xf]  ;;  %v2781_v0 = vld [vmem:[%s5582_s0 + $0x88] sm:$0xf]  ;;  %v2783_v3 = vld [vmem:[%s5582_s0 + $0xa8] sm:$0xf0] }
  0x21   :  { %v3567_v27 = vld [vmem:[%s5582_s0 + $0xdc] sm:$0xf0]  ;;  %v3560_v1 = vld [vmem:[%s5582_s0 + $0xa4] sm:$0xf0]  ;;  %v2789_v4 = vld [vmem:[%s5582_s0 + $0x90] sm:$0xf] }
  0x22   :  { %3754 = vmatpush.bf16.msra.mxu2 %v3603_v14  ;;  %957 = vmatpush.bf16.msra.mxu0 %v3603_v14  ;;  %v2778_v14 = vor.u32 %v3555_v10, %v2775_v11  ;;  %v2782_v6 = vor.u32 %v3560_v1, %v2781_v0  ;;  %v3581_v0 = vld [vmem:[%s5582_s0 + $0x154] sm:$0xf] }
  0x23   :  { %3762 = vmatpush.bf16.msra.mxu3 %v3611_v15  ;;  %1006 = vmatpush.bf16.msra.mxu1 %v3611_v15  ;;  %v3645_v15 = vld [vmem:[%s5583_s1 + $0x150] sm:$0xff] }
  0x24   :  { %v2887_v1 = vld [vmem:[%s5582_s0 + $0x170] sm:$0xf0] }
  0x25   :  { %978 = vmatmul.bf16.vlgmr.msra.gmra.mxu2 %v2838_v24  ;;  %958 = vmatmul.bf16.vlgmr.msra.gmra.mxu0 %v2710_v29  ;;  %v3595_v24 = vld [vmem:[%s5582_s0 + $0x1c4] sm:$0xf] }
  0x26   :  { %1048 = vmatpush.bf16.msrb.mxu2 %v3626_v20  ;;  %1027 = vmatmul.bf16.vlgmr.msra.gmra.mxu3 %v2842_v25  ;;  %v3635_v20 = vld [vmem:[%s5583_s1 + $0x100] sm:$0xff] }
  0x27   :  { %1097 = vmatpush.bf16.msrb.mxu3 %v3634_v21  ;;  %1007 = vmatmul.bf16.vlgmr.msra.gmra.mxu1 %v2714_v31  ;;  %v3643_v21 = vld [vmem:[%s5583_s1 + $0x140] sm:$0xff] }
  0x28   :  { %1146 = vmatpush.bf16.msrb.mxu0 %v3642_v33  ;;  %1195 = vmatpush.bf16.msrb.mxu1 %v3650_v35  ;;  %v2935_v25 = vld [vmem:[%s5582_s0 + $0x1e0] sm:$0xf0]  ;;  %v3665_v35 = vld [vmem:[%s5583_s1 + $0x1f0] sm:$0xff] }
  0x29   :  { %v2938_v29 = vor.u32 %v3595_v24, %v2935_v25  ;;  %v2807_v31 = vld [vmem:[%s5582_s0 + $0xe0] sm:$0xf0] }
  0x2a   :  { %1049 = vmatpush.bf16.msrb.mxu2 %v3625_v28  ;;  %v2934_v28 = vor.u32 %v3599_v23, %v2933_v22  ;;  %v3565_v22 = vld [vmem:[%s5582_s0 + $0xd4] sm:$0xf] }
  0x2b   :  { %1098 = vmatpush.bf16.msrb.mxu3 %v3633_v30  ;;  %v3563_v30 = vld [vmem:[%s5582_s0 + $0xc4] sm:$0xf]  ;;  %v2823_v23 = vld [vmem:[%s5582_s0 + $0xf0] sm:$0xf0] }
  0x2c   :  { %1147 = vmatpush.bf16.msrb.mxu0 %v3641_v36  ;;  %1196 = vmatpush.bf16.msrb.mxu1 %v3649_v55  ;;  %v2810_v33 = vor.u32 %v3563_v30, %v2807_v31  ;;  %v2717_v36 = vld [vmem:[%s5582_s0 + $0x8] sm:$0xf]  ;;  %v3553_v55 = vld [vmem:[%s5582_s0 + $0x6c] sm:$0xf0]  ;;  %v2826_v25 = vor.u32 %v3565_v22, %v2823_v23  ;;  %v3572_v30 = vld [vmem:[%s5582_s0 + $0x10c] sm:$0xf] }
  0x2d   :  { %v2847_v31 = vld [vmem:[%s5582_s0 + $0x128] sm:$0xf0]  ;;  %v2917_v23 = vld [vmem:[%s5582_s0 + $0x190] sm:$0xf] }
  0x2e   :  { %1050 = vmatpush.bf16.msrb.mxu2 %v3624_v32  ;;  %v2806_v32 = vor.u32 %v3567_v27, %v2805_v26  ;;  %v3653_v26 = vld [vmem:[%s5583_s1 + $0x190] sm:$0xff] }
  0x2f   :  { %1099 = vmatpush.bf16.msrb.mxu3 %v3632_v34  ;;  %v3657_v34 = vld [vmem:[%s5583_s1 + $0x1b0] sm:$0xff] }
  0x30   :  { %1148 = vmatpush.bf16.msrb.mxu0 %v3640_v56  ;;  %1197 = vmatpush.bf16.msrb.mxu1 %v3648_v57  ;;  %v3661_v27 = vld [vmem:[%s5583_s1 + $0x1d0] sm:$0xff] }
  0x32   :  { %1051 = vmatpush.bf16.msrb.mxu2 %v3623_v37  ;;  %v3544_v37 = vld [vmem:[%s5582_s0 + $0x24] sm:$0xf0] }
  0x33   :  { %1100 = vmatpush.bf16.msrb.mxu3 %v3631_v38  ;;  %v3540_v38 = vld [vmem:[%s5582_s0 + $0xc] sm:$0xf]  ;;  %v2718_v42 = vor.u32 %v3544_v37, %v2717_v36  ;;  %v3573_v36 = vld [vmem:[%s5582_s0 + $0x114] sm:$0xf] }
  0x34   :  { %1149 = vmatpush.bf16.msrb.mxu0 %v3639_v60  ;;  %1198 = vmatpush.bf16.msrb.mxu1 %v3647_v61  ;;  %v2855_v37 = vld [vmem:[%s5582_s0 + $0x130] sm:$0xf0] }
  0x35   :  { %983 = vmatmul.bf16.gmra.mxu2 %v2870_v47  ;;  %963 = vmatmul.bf16.gmra.mxu0 %v2742_v51  ;;  %v2730_v47 = vor.u32 %v3541_v44, %v2727_v45  ;;  %v3552_v51 = vld [vmem:[%s5582_s0 + $0x64] sm:$0xf0] }
  0x36   :  { %1052 = vmatpush.bf16.msrb.mxu2 %v3622_v43  ;;  %1032 = vmatmul.bf16.gmra.mxu3 %v2874_v48  ;;  %v2722_v43 = vor.u32 %v3540_v38, %v2719_v39  ;;  %v3656_v48 = vld [vmem:[%s5583_s1 + $0x1a8] sm:$0xff]  ;;  %v2750_v56 = vor.u32 %v3552_v51, %v2749_v50  ;;  %v4511_v38 = vld [vmem:[%s5584_s2] ss:$0 sm:$0xff] }
  0x37   :  { %1101 = vmatpush.bf16.msrb.mxu3 %v3630_v46  ;;  %1012 = vmatmul.bf16.gmra.mxu1 %v2746_v53  ;;  %v2726_v46 = vor.u32 %v3545_v41, %v2725_v40  ;;  %v2751_v53 = vld [vmem:[%s5582_s0 + $0x68] sm:$0xf0]  ;;  %v2858_v41 = vor.u32 %v3573_v36, %v2855_v37 }
  0x38   :  { %1150 = vmatpush.bf16.msrb.mxu0 %v3638_v2  ;;  %1199 = vmatpush.bf16.msrb.mxu1 %v3646_v5  ;;  %v3556_v2 = vld [vmem:[%s5582_s0 + $0x8c] sm:$0xf]  ;;  %v3561_v5 = vld [vmem:[%s5582_s0 + $0xac] sm:$0xf0] }
  0x39   :  { %v2786_v7 = vor.u32 %v3556_v2, %v2783_v3  ;;  %v2790_v10 = vor.u32 %v3561_v5, %v2789_v4  ;;  %v3652_v44 = vld [vmem:[%s5583_s1 + $0x188] sm:$0xff]  ;;  %v2890_v5 = vor.u32 %v3581_v0, %v2887_v1 }
  0x3a   :  { %1053 = vmatpush.bf16.msrb.mxu2 %v3621_v52  ;;  %v3548_v52 = vld [vmem:[%s5582_s0 + $0x4c] sm:$0xf] }
  0x3b   :  { %1102 = vmatpush.bf16.msrb.mxu3 %v3629_v54  ;;  %v2757_v54 = vld [vmem:[%s5582_s0 + $0x50] sm:$0xf]  ;;  %v2754_v57 = vor.u32 %v3548_v52, %v2751_v53  ;;  %v3660_v45 = vld [vmem:[%s5583_s1 + $0x1c8] sm:$0xff] }
  0x3c   :  { %1151 = vmatpush.bf16.msrb.mxu0 %v3637_v12  ;;  %1200 = vmatpush.bf16.msrb.mxu1 %v3645_v15  ;;  %v2758_v60 = vor.u32 %v3553_v55, %v2757_v54  ;;  %v3654_v12 = vld [vmem:[%s5583_s1 + $0x198] sm:$0xff]  ;;  %v3568_v15 = vld [vmem:[%s5582_s0 + $0xe4] sm:$0xf0]  ;;  %v3580_v55 = vld [vmem:[%s5582_s0 + $0x14c] sm:$0xf] }
  0x3d   :  { %v2877_v52 = vld [vmem:[%s5582_s0 + $0x148] sm:$0xf] }
  0x3e   :  { %1054 = vmatpush.bf16.msrb.mxu2 %v3620_v58  ;;  %v3549_v58 = vld [vmem:[%s5582_s0 + $0x54] sm:$0xf]  ;;  %v3584_v54 = vld [vmem:[%s5582_s0 + $0x164] sm:$0xf0] }
  0x3f   :  { %1103 = vmatpush.bf16.msrb.mxu3 %v3628_v59  ;;  %v2759_v59 = vld [vmem:[%s5582_s0 + $0x70] sm:$0xf0] }
  0x40   :  { %1152 = vmatpush.bf16.msrb.mxu0 %v3636_v18  ;;  %1201 = vmatpush.bf16.msrb.mxu1 %v3644_v19  ;;  %v2762_v61 = vor.u32 %v3549_v58, %v2759_v59  ;;  %v2821_v18 = vld [vmem:[%s5582_s0 + $0xd0] sm:$0xf] }
  0x41   :  { %v3569_v19 = vld [vmem:[%s5582_s0 + $0xec] sm:$0xf0] }
  0x42   :  { %1055 = vmatpush.bf16.msrb.mxu2 %v3619_v62  ;;  %v3655_v62 = vld [vmem:[%s5583_s1 + $0x1a0] sm:$0xff]  ;;  %v2822_v24 = vor.u32 %v3569_v19, %v2821_v18  ;;  %v2885_v59 = vld [vmem:[%s5582_s0 + $0x150] sm:$0xf]  ;;  %v3592_v18 = vld [vmem:[%s5582_s0 + $0x1a4] sm:$0xf0] }
  0x43   :  { %1104 = vmatpush.bf16.msrb.mxu3 %v3627_v63  ;;  %v3663_v63 = vld [vmem:[%s5583_s1 + $0x1e0] sm:$0xff]  ;;  %v3588_v19 = vld [vmem:[%s5582_s0 + $0x18c] sm:$0xf] }
  0x44   :  { %1153 = vmatpush.bf16.msrb.mxu0 %v3635_v20  ;;  %1202 = vmatpush.bf16.msrb.mxu1 %v3643_v21 }
  0x45   :  { %988 = vmatmul.bf16.gmra.mxu2 %v2902_v8  ;;  %968 = vmatmul.bf16.gmra.mxu0 %v2774_v13  ;;  %v3557_v8 = vld [vmem:[%s5582_s0 + $0x94] sm:$0xf]  ;;  %v3662_v13 = vld [vmem:[%s5583_s1 + $0x1d8] sm:$0xff] }
  0x46   :  { %1037 = vmatmul.bf16.gmra.mxu3 %v2906_v9  ;;  %1244 = vmatpush.bf16.msra.mxu2 %v3658_v16  ;;  %v2791_v9 = vld [vmem:[%s5582_s0 + $0xb0] sm:$0xf0]  ;;  %v3564_v16 = vld [vmem:[%s5582_s0 + $0xcc] sm:$0xf] }
  0x47   :  { %1017 = vmatmul.bf16.gmra.mxu1 %v2778_v14  ;;  %1293 = vmatpush.bf16.msra.mxu3 %v3666_v17  ;;  %v2794_v11 = vor.u32 %v3557_v8, %v2791_v9  ;;  %v2813_v14 = vld [vmem:[%s5582_s0 + $0xc8] sm:$0xf]  ;;  %v2815_v17 = vld [vmem:[%s5582_s0 + $0xe8] sm:$0xf0]  ;;  %v3651_v8 = vld [vmem:[%s5583_s1 + $0x180] sm:$0xff] }
  0x48   :  { %v2814_v20 = vor.u32 %v3568_v15, %v2813_v14  ;;  %v2818_v21 = vor.u32 %v3564_v16, %v2815_v17  ;;  %v3659_v9 = vld [vmem:[%s5583_s1 + $0x1c0] sm:$0xff]  ;;  %v2909_v16 = vld [vmem:[%s5582_s0 + $0x188] sm:$0xf] }
  0x4a   :  { %1245 = vmatpush.bf16.msra.mxu2 %v3657_v34 }
  0x4b   :  { %1294 = vmatpush.bf16.msra.mxu3 %v3665_v35  ;;  %v2850_v35 = vor.u32 %v3572_v30, %v2847_v31 }
  0x4e   :  { %1246 = vmatpush.bf16.msra.mxu2 %v3656_v48 }
  0x4f   :  { %1295 = vmatpush.bf16.msra.mxu3 %v3664_v49 }
  0x52   :  { %1247 = vmatpush.bf16.msra.mxu2 %v3655_v62  ;;  %v2878_v62 = vor.u32 %v3584_v54, %v2877_v52  ;;  %v2949_v54 = vld [vmem:[%s5582_s0 + $0x1d0] sm:$0xf] }
  0x53   :  { %1296 = vmatpush.bf16.msra.mxu3 %v3663_v63 }
  0x55   :  { %993 = vmatmul.bf16.gmra.mxu2 %v2934_v28  ;;  %973 = vmatmul.bf16.gmra.mxu0 %v2806_v32  ;;  %v2845_v28 = vld [vmem:[%s5582_s0 + $0x108] sm:$0xf]  ;;  %v2853_v32 = vld [vmem:[%s5582_s0 + $0x110] sm:$0xf] }
  0x56   :  { %1042 = vmatmul.bf16.gmra.mxu3 %v2938_v29  ;;  %1248 = vmatpush.bf16.msra.mxu2 %v3654_v12  ;;  %v3576_v29 = vld [vmem:[%s5582_s0 + $0x124] sm:$0xf0] }
  0x57   :  { %1022 = vmatmul.bf16.gmra.mxu1 %v2810_v33  ;;  %1297 = vmatpush.bf16.msra.mxu3 %v3662_v13  ;;  %v3577_v33 = vld [vmem:[%s5582_s0 + $0x12c] sm:$0xf0]  ;;  %v2846_v34 = vor.u32 %v3576_v29, %v2845_v28  ;;  %v3589_v28 = vld [vmem:[%s5582_s0 + $0x194] sm:$0xf] }
  0x58   :  { %v2854_v39 = vor.u32 %v3577_v33, %v2853_v32  ;;  %v2919_v29 = vld [vmem:[%s5582_s0 + $0x1b0] sm:$0xf0] }
  0x59   :  { %v2922_v33 = vor.u32 %v3589_v28, %v2919_v29  ;;  %v3673_v29 = vld [vmem:[%s5585_s3 + $0x30] sm:$0xff] }
  0x5a   :  { %1249 = vmatpush.bf16.msra.mxu2 %v3653_v26  ;;  %v2910_v26 = vor.u32 %v3592_v18, %v2909_v16  ;;  %v2735_v16 = vld [vmem:[%s5582_s0 + $0x38] sm:$0xf0] }
  0x5b   :  { %1298 = vmatpush.bf16.msra.mxu3 %v3661_v27 }
  0x5e   :  { %1250 = vmatpush.bf16.msra.mxu2 %v3652_v44 }
  0x5f   :  { %1299 = vmatpush.bf16.msra.mxu3 %v3660_v45  ;;  %v3600_v45 = vld [vmem:[%s5582_s0 + $0x1e4] sm:$0xf0] }
  0x62   :  { %1251 = vmatpush.bf16.msra.mxu2 %v3651_v8 }
  0x63   :  { %1300 = vmatpush.bf16.msra.mxu3 %v3659_v9  ;;  %v3674_v9 = vld [vmem:[%s5585_s3 + $0x38] sm:$0xff] }
  0x64   :  { %1434 = vmatpush.bf16.msra.mxu0 %v3674_v9  ;;  %v2829_v9 = vld [vmem:[%s5582_s0 + $0xd8] sm:$0xf] }
  0x65   :  { %1056 = vmatmul.bf16.vlgmr.msrb.gmra.mxu2 %v2718_v42  ;;  %1154 = vmatmul.bf16.vlgmr.msrb.gmra.mxu0 %v2726_v46 }
  0x66   :  { %1105 = vmatmul.bf16.vlgmr.msrb.gmra.mxu3 %v2722_v43 }
  0x67   :  { %1203 = vmatmul.bf16.vlgmr.msrb.gmra.mxu1 %v2730_v47 }
  0x68   :  { %1435 = vmatpush.bf16.msra.mxu0 %v3673_v29 }
  0x75   :  { %1061 = vmatmul.bf16.gmra.mxu2 %v2750_v56  ;;  %1159 = vmatmul.bf16.gmra.mxu0 %v2758_v60  ;;  %v2879_v56 = vld [vmem:[%s5582_s0 + $0x168] sm:$0xf0]  ;;  %v3585_v60 = vld [vmem:[%s5582_s0 + $0x16c] sm:$0xf0] }
  0x76   :  { %1110 = vmatmul.bf16.gmra.mxu3 %v2754_v57  ;;  %v2882_v63 = vor.u32 %v3580_v55, %v2879_v56  ;;  %v2886_v3 = vor.u32 %v3585_v60, %v2885_v59  ;;  %v3601_v55 = vld [vmem:[%s5582_s0 + $0x1ec] sm:$0xf0]  ;;  %v3597_v59 = vld [vmem:[%s5582_s0 + $0x1d4] sm:$0xf] }
  0x77   :  { %1208 = vmatmul.bf16.gmra.mxu1 %v2762_v61  ;;  %v2951_v60 = vld [vmem:[%s5582_s0 + $0x1f0] sm:$0xf0] }
  0x78   :  { %v2954_v0 = vor.u32 %v3597_v59, %v2951_v60 }
  0x85   :  { %1066 = vmatmul.bf16.gmra.mxu2 %v2782_v6  ;;  %1164 = vmatmul.bf16.gmra.mxu0 %v2790_v10 }
  0x86   :  { %1115 = vmatmul.bf16.gmra.mxu3 %v2786_v7 }
  0x87   :  { %1213 = vmatmul.bf16.gmra.mxu1 %v2794_v11 }
  0x95   :  { %1071 = vmatmul.bf16.gmra.mxu2 %v2814_v20  ;;  %1169 = vmatmul.bf16.gmra.mxu0 %v2822_v24  ;;  %v2911_v20 = vld [vmem:[%s5582_s0 + $0x1a8] sm:$0xf0]  ;;  %v3593_v24 = vld [vmem:[%s5582_s0 + $0x1ac] sm:$0xf0] }
  0x96   :  { %1120 = vmatmul.bf16.gmra.mxu3 %v2818_v21  ;;  %v2914_v27 = vor.u32 %v3588_v19, %v2911_v20  ;;  %v2918_v31 = vor.u32 %v3593_v24, %v2917_v23 }
  0x97   :  { %1218 = vmatmul.bf16.gmra.mxu1 %v2826_v25 }
  0xa2   :  { %v959_v40 = vpop.f32.mrf.mxu0 }
  0xa3   :  { %v960_v42 = vadd.f32 %v4511_v38, %v959_v40 }
  0xa4   :  { %v1008_v43 = vpop.f32.mrf.mxu1 }
  0xa5   :  { %1076 = vmatmul.bf16.gmra.mxu2 %v2846_v34  ;;  %v4520_v46 = vadd.f32 %v1008_v43, %v960_v42  ;;  %1174 = vmatmul.bf16.gmra.mxu0 %v2854_v39  ;;  %v2941_v43 = vld [vmem:[%s5582_s0 + $0x1c8] sm:$0xf] }
  0xa6   :  { %1125 = vmatmul.bf16.gmra.mxu3 %v2850_v35 }
  0xa7   :  { %1223 = vmatmul.bf16.gmra.mxu1 %v2858_v41 }
  0xa8   :  { %v979_v47 = vpop.f32.mrf.mxu2 }
  0xa9   :  { %v1028_v48 = vpop.f32.mrf.mxu3  ;;  %v980_v49 = vadd.f32 %v4511_v38, %v979_v47  ;;  %v3596_v47 = vld [vmem:[%s5582_s0 + $0x1cc] sm:$0xf] }
  0xaa   :  { %v4525_v51 = vpop.f32.mrf.mxu0 }
  0xab   :  { %v4523_v50 = vadd.f32 %v1028_v48, %v980_v49  ;;  %v2943_v48 = vld [vmem:[%s5582_s0 + $0x1e8] sm:$0xf0] }
  0xac   :  { %v4530_v53 = vpop.f32.mrf.mxu1 }
  0xb0   :  { %v981_v57 = vpop.f32.mrf.mxu2 }
  0xb1   :  { %v1030_v58 = vpop.f32.mrf.mxu3  ;;  %v982_v61 = vadd.f32 %v4511_v38, %v981_v57  ;;  %v2942_v57 = vor.u32 %v3600_v45, %v2941_v43 }
  0xb2   :  { %v964_v4 = vpop.f32.mrf.mxu0 }
  0xb3   :  { %v4554_v2 = vadd.f32 %v1030_v58, %v982_v61  ;;  %v965_v6 = vadd.f32 %v4511_v38, %v964_v4  ;;  %v2946_v58 = vor.u32 %v3596_v47, %v2943_v48 }
  0xb4   :  { %v1013_v7 = vpop.f32.mrf.mxu1 }
  0xb5   :  { %1081 = vmatmul.bf16.gmra.mxu2 %v2878_v62  ;;  %v4563_v10 = vadd.f32 %v1013_v7, %v965_v6  ;;  %1179 = vmatmul.bf16.gmra.mxu0 %v2886_v3  ;;  %v2950_v62 = vor.u32 %v3601_v55, %v2949_v54  ;;  %v2797_v55 = vld [vmem:[%s5582_s0 + $0x98] sm:$0xf] }
  0xb6   :  { %1130 = vmatmul.bf16.gmra.mxu3 %v2882_v63 }
  0xb7   :  { %1228 = vmatmul.bf16.gmra.mxu1 %v2890_v5 }
  0xb8   :  { %v984_v11 = vpop.f32.mrf.mxu2 }
  0xb9   :  { %v1033_v12 = vpop.f32.mrf.mxu3  ;;  %v985_v13 = vadd.f32 %v4511_v38, %v984_v11  ;;  %v2733_v11 = vld [vmem:[%s5582_s0 + $0x18] sm:$0xf] }
  0xba   :  { %v4568_v15 = vpop.f32.mrf.mxu0 }
  0xbb   :  { %v4566_v14 = vadd.f32 %v1033_v12, %v985_v13  ;;  %v3546_v12 = vld [vmem:[%s5582_s0 + $0x34] sm:$0xf0]  ;;  %v3542_v13 = vld [vmem:[%s5582_s0 + $0x1c] sm:$0xf]  ;;  %v967_v47 = vadd.f32 %v4511_v38, %v4568_v15 }
  0xbc   :  { %v4573_v17 = vpop.f32.mrf.mxu1  ;;  %v2799_v15 = vld [vmem:[%s5582_s0 + $0xb8] sm:$0xf0] }
  0xbd   :  { %v1016_v54 = vadd.f32 %v4573_v17, %v967_v47 }
  0xc0   :  { %v986_v21 = vpop.f32.mrf.mxu2 }
  0xc1   :  { %v1035_v22 = vpop.f32.mrf.mxu3  ;;  %v987_v25 = vadd.f32 %v4511_v38, %v986_v21  ;;  %v2734_v21 = vor.u32 %v3546_v12, %v2733_v11  ;;  %v3570_v11 = vld [vmem:[%s5582_s0 + $0xf4] sm:$0xf0] }
  0xc2   :  { %v969_v32 = vpop.f32.mrf.mxu0 }
  0xc3   :  { %v4597_v30 = vadd.f32 %v1035_v22, %v987_v25  ;;  %v970_v34 = vadd.f32 %v4511_v38, %v969_v32  ;;  %v2738_v22 = vor.u32 %v3542_v13, %v2735_v16  ;;  %v2765_v32 = vld [vmem:[%s5582_s0 + $0x58] sm:$0xf]  ;;  %v2830_v16 = vor.u32 %v3570_v11, %v2829_v9 }
  0xc4   :  { %v1018_v35 = vpop.f32.mrf.mxu1 }
  0xc5   :  { %1086 = vmatmul.bf16.gmra.mxu2 %v2910_v26  ;;  %v4600_v36 = vadd.f32 %v1018_v35, %v970_v34  ;;  %1184 = vmatmul.bf16.gmra.mxu0 %v2918_v31  ;;  %v962_v26 = vadd.f32 %v4511_v38, %v4525_v51  ;;  %v2767_v51 = vld [vmem:[%s5582_s0 + $0x78] sm:$0xf0] }
  0xc6   :  { %1135 = vmatmul.bf16.gmra.mxu3 %v2914_v27 }
  0xc7   :  { %1233 = vmatmul.bf16.gmra.mxu1 %v2922_v33  ;;  %v1011_v31 = vadd.f32 %v4530_v53, %v962_v26  ;;  %v3554_v33 = vld [vmem:[%s5582_s0 + $0x74] sm:$0xf0] }
  0xc8   :  { %v989_v37 = vpop.f32.mrf.mxu2 }
  0xc9   :  { %v1038_v39 = vpop.f32.mrf.mxu3  ;;  %v990_v40 = vadd.f32 %v4511_v38, %v989_v37  ;;  %v2766_v37 = vor.u32 %v3554_v33, %v2765_v32  ;;  %v2861_v32 = vld [vmem:[%s5582_s0 + $0x118] sm:$0xf] }
  0xca   :  { %v4605_v42 = vpop.f32.mrf.mxu0  ;;  %v3578_v33 = vld [vmem:[%s5582_s0 + $0x134] sm:$0xf0] }
  0xcb   :  { %v4603_v41 = vadd.f32 %v1038_v39, %v990_v40 }
  0xcc   :  { %v4610_v44 = vpop.f32.mrf.mxu1 }
  0xd0   :  { %v991_v49 = vpop.f32.mrf.mxu2 }
  0xd1   :  { %v1040_v52 = vpop.f32.mrf.mxu3  ;;  %v992_v56 = vadd.f32 %v4511_v38, %v991_v49 }
  0xd2   :  { %v974_v63 = vpop.f32.mrf.mxu0 }
  0xd3   :  { %v4634_v61 = vadd.f32 %v1040_v52, %v992_v56  ;;  %v975_v1 = vadd.f32 %v4511_v38, %v974_v63  ;;  %v3672_v52 = vld [vmem:[%s5585_s3 + $0x28] sm:$0xff]  ;;  %v3562_v56 = vld [vmem:[%s5582_s0 + $0xb4] sm:$0xf0] }
  0xd4   :  { %v1023_v3 = vpop.f32.mrf.mxu1  ;;  %1436 = vmatpush.bf16.msra.mxu0 %v3672_v52  ;;  %v2798_v59 = vor.u32 %v3562_v56, %v2797_v55  ;;  %v2893_v52 = vld [vmem:[%s5582_s0 + $0x158] sm:$0xf]  ;;  %v3582_v55 = vld [vmem:[%s5582_s0 + $0x15c] sm:$0xf] }
  0xd5   :  { %1091 = vmatmul.bf16.gmra.mxu2 %v2942_v57  ;;  %v4637_v4 = vadd.f32 %v1023_v3, %v975_v1  ;;  %1189 = vmatmul.bf16.gmra.mxu0 %v2950_v62  ;;  %v972_v1 = vadd.f32 %v4511_v38, %v4605_v42  ;;  %v2831_v42 = vld [vmem:[%s5582_s0 + $0xf8] sm:$0xf0] }
  0xd6   :  { %1140 = vmatmul.bf16.gmra.mxu3 %v2946_v58 }
  0xd7   :  { %1238 = vmatmul.bf16.gmra.mxu1 %v2954_v0 }
  0xd8   :  { %v994_v5 = vpop.f32.mrf.mxu2 }
  0xd9   :  { %v1043_v6 = vpop.f32.mrf.mxu3  ;;  %v995_v7 = vadd.f32 %v4511_v38, %v994_v5 }
  0xdb   :  { %v4640_v8 = vadd.f32 %v1043_v6, %v995_v7  ;;  %v3671_v6 = vld [vmem:[%s5585_s3 + $0x20] sm:$0xff]  ;;  %v1021_v7 = vadd.f32 %v4610_v44, %v972_v1  ;;  %v3594_v1 = vld [vmem:[%s5582_s0 + $0x1b4] sm:$0xf0] }
  0xdc   :  { %1437 = vmatpush.bf16.msra.mxu0 %v3671_v6  ;;  %v1025_v29 = vpop.f32.mrf.mxu1 }
  0xe0   :  { %v996_v18 = vpop.f32.mrf.mxu2 }
  0xe1   :  { %v1045_v19 = vpop.f32.mrf.mxu3  ;;  %v997_v20 = vadd.f32 %v4511_v38, %v996_v18 }
  0xe3   :  { %v4658_v23 = vadd.f32 %v1045_v19, %v997_v20  ;;  %v976_v20 = vpop.f32.mrf.mxu0 }
  0xe5   :  { %1252 = vmatmul.bf16.vlgmr.msra.gmra.mxu2 %v2734_v21 }
  0xe6   :  { %1301 = vmatmul.bf16.vlgmr.msra.gmra.mxu3 %v2738_v22 }
  0xe8   :  { %v1057_v24 = vpop.f32.mrf.mxu2 }
  0xe9   :  { %v1106_v25 = vpop.f32.mrf.mxu3  ;;  %v1058_v27 = vadd.f32 %v1057_v24, %v4520_v46  ;;  %v3550_v46 = vld [vmem:[%s5582_s0 + $0x5c] sm:$0xf]  ;;  %v977_v24 = vadd.f32 %v4511_v38, %v976_v20  ;;  %v2957_v20 = vld [vmem:[%s5582_s0 + $0x1d8] sm:$0xf] }
  0xea   :  { %v2770_v39 = vor.u32 %v3550_v46, %v2767_v51  ;;  %v3574_v38 = vld [vmem:[%s5582_s0 + $0x11c] sm:$0xf] }
  0xeb   :  { %v4663_v28 = vadd.f32 %v1106_v25, %v1058_v27  ;;  %v3670_v27 = vld [vmem:[%s5585_s3 + $0x18] sm:$0xff]  ;;  %v1155_v9 = vpop.f32.mrf.mxu0 }
  0xec   :  { %1438 = vmatpush.bf16.msra.mxu0 %v3670_v27 }
  0xf0   :  { %v1059_v34 = vpop.f32.mrf.mxu2 }
  0xf1   :  { %v1108_v35 = vpop.f32.mrf.mxu3  ;;  %v1060_v53 = vadd.f32 %v1059_v34, %v1011_v31  ;;  %v1026_v31 = vadd.f32 %v1025_v29, %v977_v24  ;;  %v3598_v24 = vld [vmem:[%s5582_s0 + $0x1dc] sm:$0xf] }
  0xf3   :  { %v4681_v40 = vadd.f32 %v1108_v35, %v1060_v53  ;;  %v2862_v35 = vor.u32 %v3578_v33, %v2861_v32 }
  0xf5   :  { %1257 = vmatmul.bf16.gmra.mxu2 %v2766_v37 }
  0xf6   :  { %1306 = vmatmul.bf16.gmra.mxu3 %v2770_v39 }
  0xf8   :  { %v1062_v43 = vpop.f32.mrf.mxu2 }
  0xf9   :  { %v1111_v45 = vpop.f32.mrf.mxu3  ;;  %v1063_v48 = vadd.f32 %v1062_v43, %v4563_v10  ;;  %v3558_v10 = vld [vmem:[%s5582_s0 + $0x9c] sm:$0xf] }
  0xfa   :  { %v2802_v60 = vor.u32 %v3558_v10, %v2799_v15 }
  0xfb   :  { %v4686_v49 = vadd.f32 %v1111_v45, %v1063_v48  ;;  %v3669_v48 = vld [vmem:[%s5585_s3 + $0x10] sm:$0xff] }
  0xfc   :  { %1439 = vmatpush.bf16.msra.mxu0 %v3669_v48  ;;  %v1156_v48 = vadd.f32 %v1155_v9, %v4663_v28  ;;  %v3681_v28 = vld [vmem:[%s5587_s5 + $0x30] sm:$0xff] }
 0x100   :  { %v1064_v57 = vpop.f32.mrf.mxu2 }
 0x101   :  { %v1113_v58 = vpop.f32.mrf.mxu3  ;;  %v1065_v17 = vadd.f32 %v1064_v57, %v1016_v54  ;;  %v3586_v54 = vld [vmem:[%s5582_s0 + $0x174] sm:$0xf0] }
 0x102   :  { %v2894_v15 = vor.u32 %v3586_v54, %v2893_v52 }
 0x103   :  { %v4704_v62 = vadd.f32 %v1113_v58, %v1065_v17 }
 0x105   :  { %1262 = vmatmul.bf16.gmra.mxu2 %v2798_v59 }
 0x106   :  { %1311 = vmatmul.bf16.gmra.mxu3 %v2802_v60 }
 0x108   :  { %v1067_v63 = vpop.f32.mrf.mxu2 }
 0x109   :  { %v1116_v0 = vpop.f32.mrf.mxu3  ;;  %v1068_v3 = vadd.f32 %v1067_v63, %v4600_v36  ;;  %v3566_v36 = vld [vmem:[%s5582_s0 + $0xdc] sm:$0xf]  ;;  %v3668_v63 = vld [vmem:[%s5585_s3 + $0x8] sm:$0xff] }
 0x10a   :  { %v2834_v18 = vor.u32 %v3566_v36, %v2831_v42  ;;  %1440 = vmatpush.bf16.msra.mxu0 %v3668_v63  ;;  %v1204_v42 = vpop.f32.mrf.mxu1 }
 0x10b   :  { %v4709_v5 = vadd.f32 %v1116_v0, %v1068_v3  ;;  %v2925_v0 = vld [vmem:[%s5582_s0 + $0x198] sm:$0xf]  ;;  %v3590_v3 = vld [vmem:[%s5582_s0 + $0x19c] sm:$0xf] }
 0x10c   :  { %v2926_v11 = vor.u32 %v3594_v1, %v2925_v0 }
 0x110   :  { %v1069_v12 = vpop.f32.mrf.mxu2 }
 0x111   :  { %v1118_v13 = vpop.f32.mrf.mxu3  ;;  %v1070_v44 = vadd.f32 %v1069_v12, %v1021_v7 }
 0x113   :  { %v4727_v19 = vadd.f32 %v1118_v13, %v1070_v44 }
 0x115   :  { %1267 = vmatmul.bf16.gmra.mxu2 %v2830_v16  ;;  %v1157_v16 = vpop.f32.mrf.mxu0 }
 0x116   :  { %1316 = vmatmul.bf16.gmra.mxu3 %v2834_v18 }
 0x118   :  { %v1072_v21 = vpop.f32.mrf.mxu2 }
 0x119   :  { %v1121_v22 = vpop.f32.mrf.mxu3  ;;  %v1073_v25 = vadd.f32 %v1072_v21, %v4637_v4  ;;  %v2863_v4 = vld [vmem:[%s5582_s0 + $0x138] sm:$0xf0]  ;;  %v3667_v21 = vld [vmem:[%s5585_s3] sm:$0xff] }
 0x11a   :  { %v2866_v53 = vor.u32 %v3574_v38, %v2863_v4  ;;  %1441 = vmatpush.bf16.msra.mxu0 %v3667_v21 }
 0x11b   :  { %v4731_v26 = vadd.f32 %v1121_v22, %v1073_v25  ;;  %v3602_v22 = vld [vmem:[%s5582_s0 + $0x1f4] sm:$0xf0]  ;;  %v1206_v25 = vpop.f32.mrf.mxu1 }
 0x11d   :  { %v1160_v33 = vpop.f32.mrf.mxu0 }
 0x11e   :  { %v1161_v9 = vadd.f32 %v1160_v33, %v4686_v49  ;;  %v3680_v33 = vld [vmem:[%s5587_s5 + $0x28] sm:$0xff] }
 0x120   :  { %v1074_v46 = vpop.f32.mrf.mxu2 }
 0x121   :  { %v1123_v51 = vpop.f32.mrf.mxu3  ;;  %v1075_v34 = vadd.f32 %v1074_v46, %v1026_v31  ;;  %v2958_v31 = vor.u32 %v3602_v22, %v2957_v20 }
 0x123   :  { %v4748_v37 = vadd.f32 %v1123_v51, %v1075_v34  ;;  %v1209_v46 = vpop.f32.mrf.mxu1 }
 0x125   :  { %1272 = vmatmul.bf16.gmra.mxu2 %v2862_v35  ;;  %v1162_v35 = vpop.f32.mrf.mxu0 }
 0x126   :  { %1321 = vmatmul.bf16.gmra.mxu3 %v2866_v53 }
 0x128   :  { %v1077_v39 = vpop.f32.mrf.mxu2 }
 0x129   :  { %v1126_v43 = vpop.f32.mrf.mxu3  ;;  %v1078_v45 = vadd.f32 %v1077_v39, %v4523_v50  ;;  %v2895_v50 = vld [vmem:[%s5582_s0 + $0x178] sm:$0xf0] }
 0x12a   :  { %v2898_v57 = vor.u32 %v3582_v55, %v2895_v50  ;;  %v1205_v50 = vadd.f32 %v1204_v42, %v1156_v48 }
 0x12b   :  { %v4751_v47 = vadd.f32 %v1126_v43, %v1078_v45  ;;  %v1211_v43 = vpop.f32.mrf.mxu1  ;;  %v3682_v45 = vld [vmem:[%s5587_s5 + $0x38] sm:$0xff] }
 0x12c   :  { %1575 = vmatpush.bf16.msra.mxu1 %v3682_v45 }
 0x12d   :  { %v1165_v55 = vpop.f32.mrf.mxu0 }
 0x130   :  { %v4768_v56 = vpop.f32.mrf.mxu2  ;;  %1576 = vmatpush.bf16.msra.mxu1 %v3681_v28 }
 0x131   :  { %v4770_v10 = vpop.f32.mrf.mxu3 }
 0x134   :  { %1577 = vmatpush.bf16.msra.mxu1 %v3680_v33 }
 0x135   :  { %1277 = vmatmul.bf16.gmra.mxu2 %v2894_v15  ;;  %v1214_v15 = vpop.f32.mrf.mxu1  ;;  %v1167_v1 = vpop.f32.mrf.mxu0 }
 0x136   :  { %1326 = vmatmul.bf16.gmra.mxu3 %v2898_v57  ;;  %v1168_v45 = vadd.f32 %v1167_v1, %v4727_v19 }
 0x138   :  { %v1082_v58 = vpop.f32.mrf.mxu2 }
 0x139   :  { %v1131_v17 = vpop.f32.mrf.mxu3  ;;  %v1083_v59 = vadd.f32 %v1082_v58, %v4566_v14  ;;  %v2927_v14 = vld [vmem:[%s5582_s0 + $0x1b8] sm:$0xf0] }
 0x13a   :  { %v2930_v36 = vor.u32 %v3590_v3, %v2927_v14 }
 0x13b   :  { %v4773_v60 = vadd.f32 %v1131_v17, %v1083_v59 }
 0x140   :  { %v4790_v6 = vpop.f32.mrf.mxu2 }
 0x141   :  { %v4792_v7 = vpop.f32.mrf.mxu3 }
 0x145   :  { %1282 = vmatmul.bf16.gmra.mxu2 %v2926_v11 }
 0x146   :  { %1331 = vmatmul.bf16.gmra.mxu3 %v2930_v36  ;;  %v1216_v36 = vpop.f32.mrf.mxu1 }
 0x148   :  { %v1087_v12 = vpop.f32.mrf.mxu2 }
 0x149   :  { %v1136_v13 = vpop.f32.mrf.mxu3  ;;  %v1088_v44 = vadd.f32 %v1087_v12, %v4603_v41  ;;  %v2959_v41 = vld [vmem:[%s5582_s0 + $0x1f8] sm:$0xf0] }
 0x14a   :  { %v2962_v32 = vor.u32 %v3598_v24, %v2959_v41 }
 0x14b   :  { %v4795_v18 = vadd.f32 %v1136_v13, %v1088_v44  ;;  %v1210_v13 = vadd.f32 %v1209_v46, %v1161_v9  ;;  %v1163_v44 = vadd.f32 %v1162_v35, %v4704_v62 }
 0x14d   :  { %v1212_v21 = vadd.f32 %v1211_v43, %v1163_v44 }
 0x14e   :  { %v1219_v41 = vpop.f32.mrf.mxu1 }
 0x150   :  { %v4812_v27 = vpop.f32.mrf.mxu2 }
 0x151   :  { %v4814_v29 = vpop.f32.mrf.mxu3 }
 0x155   :  { %1287 = vmatmul.bf16.gmra.mxu2 %v2958_v31 }
 0x156   :  { %1336 = vmatmul.bf16.gmra.mxu3 %v2962_v32  ;;  %v1221_v48 = vpop.f32.mrf.mxu1 }
 0x158   :  { %v1092_v38 = vpop.f32.mrf.mxu2 }
 0x159   :  { %v1141_v4 = vpop.f32.mrf.mxu3  ;;  %v1093_v51 = vadd.f32 %v1092_v38, %v4640_v8  ;;  %v1158_v8 = vadd.f32 %v1157_v16, %v4681_v40  ;;  %v1170_v16 = vpop.f32.mrf.mxu0 }
 0x15b   :  { %v4817_v34 = vadd.f32 %v1141_v4, %v1093_v51  ;;  %v1207_v58 = vadd.f32 %v1206_v25, %v1158_v8  ;;  %v1166_v4 = vadd.f32 %v1165_v55, %v4709_v5 }
 0x15d   :  { %v1215_v43 = vadd.f32 %v1214_v15, %v1166_v4  ;;  %v1171_v15 = vadd.f32 %v1170_v16, %v4731_v26 }
 0x160   :  { %v4819_v53 = vpop.f32.mrf.mxu2 }
 0x161   :  { %v4821_v39 = vpop.f32.mrf.mxu3  ;;  %v1172_v46 = vpop.f32.mrf.mxu0 }
 0x168   :  { %v1253_v52 = vpop.f32.mrf.mxu2 }
 0x169   :  { %v1302_v54 = vpop.f32.mrf.mxu3  ;;  %v1254_v57 = vadd.f32 %v1253_v52, %v1205_v50 }
 0x16b   :  { %v1303_v63 = vadd.f32 %v1302_v54, %v1254_v57  ;;  %v1217_v54 = vadd.f32 %v1216_v36, %v1168_v45  ;;  %v1175_v57 = vpop.f32.mrf.mxu0 }
 0x16d   :  { %v1342_v14 = vmax.f32 %v1303_v63, 0.0  ;;  %v1224_v63 = vpop.f32.mrf.mxu1 }
 0x170   :  { %v1255_v17 = vpop.f32.mrf.mxu2 }
 0x171   :  { %v1304_v59 = vpop.f32.mrf.mxu3  ;;  %v1256_v0 = vadd.f32 %v1255_v17, %v1207_v58 }
 0x173   :  { %v1305_v3 = vadd.f32 %v1304_v59, %v1256_v0  ;;  %v3679_v0 = vld [vmem:[%s5587_s5 + $0x20] sm:$0xff]  ;;  %v1177_v28 = vpop.f32.mrf.mxu0 }
 0x174   :  { %1578 = vmatpush.bf16.msra.mxu1 %v3679_v0 }
 0x175   :  { %v1343_v11 = vmax.f32 %v1305_v3, 0.0 }
 0x177   :  { %v1358_v42 = vpack.c.bf16 %v1343_v11, %v1342_v14  ;;  %v1220_v14 = vadd.f32 %v1219_v41, %v1171_v15  ;;  %v1173_v11 = vadd.f32 %v1172_v46, %v4748_v37  ;;  %v1176_v37 = vadd.f32 %v1175_v57, %v4751_v47 }
 0x178   :  { %v1258_v40 = vpop.f32.mrf.mxu2  ;;  %v1085_v47 = vadd.f32 %v4790_v6, %v4597_v30 }
 0x179   :  { %v1307_v12 = vpop.f32.mrf.mxu3  ;;  %1442 = vmatmul.bf16.vlgmr.msra.gmra.mxu0 %v1358_v42  ;;  %v1259_v20 = vadd.f32 %v1258_v40, %v1210_v13  ;;  %v1222_v36 = vadd.f32 %v1221_v48, %v1173_v11  ;;  %v1226_v42 = vpop.f32.mrf.mxu1  ;;  %v3676_v11 = vld [vmem:[%s5587_s5 + $0x8] sm:$0xff] }
 0x17b   :  { %v1308_v25 = vadd.f32 %v1307_v12, %v1259_v20  ;;  %v1080_v20 = vadd.f32 %v4768_v56, %v4554_v2  ;;  %v1180_v16 = vpop.f32.mrf.mxu0 }
 0x17d   :  { %v1344_v38 = vmax.f32 %v1308_v25, 0.0  ;;  %v1129_v41 = vadd.f32 %v4770_v10, %v1080_v20 }
 0x17f   :  { %v1178_v2 = vadd.f32 %v1177_v28, %v1129_v41 }
 0x180   :  { %v1260_v22 = vpop.f32.mrf.mxu2 }
 0x181   :  { %v1309_v24 = vpop.f32.mrf.mxu3  ;;  %v1261_v31 = vadd.f32 %v1260_v22, %v1212_v21  ;;  %v1227_v33 = vadd.f32 %v1226_v42, %v1178_v2 }
 0x183   :  { %v1310_v32 = vadd.f32 %v1309_v24, %v1261_v31  ;;  %v3678_v24 = vld [vmem:[%s5587_s5 + $0x18] sm:$0xff]  ;;  %v1182_v4 = vpop.f32.mrf.mxu0 }
 0x184   :  { %1579 = vmatpush.bf16.msra.mxu1 %v3678_v24  ;;  %v1095_v24 = vadd.f32 %v4819_v53, %v4658_v23 }
 0x185   :  { %v1345_v49 = vmax.f32 %v1310_v32, 0.0 }
 0x187   :  { %v1359_v51 = vpack.c.bf16 %v1345_v49, %v1344_v38  ;;  %v1229_v38 = vpop.f32.mrf.mxu1  ;;  %v1225_v49 = vadd.f32 %v1224_v63, %v1176_v37 }
 0x188   :  { %v1263_v62 = vpop.f32.mrf.mxu2 }
 0x189   :  { %v1312_v35 = vpop.f32.mrf.mxu3  ;;  %1447 = vmatmul.bf16.gmra.mxu0 %v1359_v51  ;;  %v1264_v52 = vadd.f32 %v1263_v62, %v1215_v43 }
 0x18b   :  { %v1313_v58 = vadd.f32 %v1312_v35, %v1264_v52  ;;  %v3677_v52 = vld [vmem:[%s5587_s5 + $0x10] sm:$0xff] }
 0x18c   :  { %1580 = vmatpush.bf16.msra.mxu1 %v3677_v52  ;;  %v3739_v52 = vld [vmem:[#allocation2 + $0x1c4] sm:$0xf] }
 0x18d   :  { %v1346_v5 = vmax.f32 %v1313_v58, 0.0 }
 0x18f   :  { %v1231_v43 = vpop.f32.mrf.mxu1 }
 0x190   :  { %v1265_v50 = vpop.f32.mrf.mxu2  ;;  %1581 = vmatpush.bf16.msra.mxu1 %v3676_v11 }
 0x191   :  { %v1314_v8 = vpop.f32.mrf.mxu3  ;;  %v1266_v17 = vadd.f32 %v1265_v50, %v1217_v54  ;;  %v1181_v54 = vadd.f32 %v1180_v16, %v4773_v60  ;;  %v1134_v50 = vadd.f32 %v4792_v7, %v1085_v47  ;;  %v1090_v60 = vadd.f32 %v4812_v27, %v4634_v61  ;;  %v3675_v61 = vld [vmem:[%s5587_s5] sm:$0xff] }
 0x193   :  { %v1315_v59 = vadd.f32 %v1314_v8, %v1266_v17  ;;  %v1185_v17 = vpop.f32.mrf.mxu0  ;;  %v1183_v30 = vadd.f32 %v1182_v4, %v1134_v50 }
 0x194   :  { %v1186_v28 = vadd.f32 %v1185_v17, %v4795_v18  ;;  %1582 = vmatpush.bf16.msra.mxu1 %v3675_v61  ;;  %v3744_v17 = vld [vmem:[#allocation2 + $0x1e4] sm:$0xf0] }
 0x195   :  { %v1347_v55 = vmax.f32 %v1315_v59, 0.0  ;;  %v1230_v59 = vadd.f32 %v1229_v38, %v1181_v54  ;;  %v4874_v54 = vld [vmem:[%s5586_s4] ss:$0 sm:$0xff] }
 0x197   :  { %v1360_v3 = vpack.c.bf16 %v1347_v55, %v1346_v5  ;;  %v1234_v6 = vpop.f32.mrf.mxu1  ;;  %v1232_v5 = vadd.f32 %v1231_v43, %v1183_v30 }
 0x198   :  { %v1268_v19 = vpop.f32.mrf.mxu2  ;;  %v1235_v27 = vadd.f32 %v1234_v6, %v1186_v28  ;;  %v3519_v6 = vld [vmem:[#allocation2 + $0x1e8] sm:$0xf0]  ;;  %v3485_v28 = vld [vmem:[#allocation2 + $0x188] sm:$0xf] }
 0x199   :  { %v1317_v1 = vpop.f32.mrf.mxu3  ;;  %1452 = vmatmul.bf16.gmra.mxu0 %v1360_v3  ;;  %v1269_v9 = vadd.f32 %v1268_v19, %v1220_v14 }
 0x19b   :  { %v1318_v13 = vadd.f32 %v1317_v1, %v1269_v9  ;;  %v1187_v19 = vpop.f32.mrf.mxu0  ;;  %v1139_v9 = vadd.f32 %v4814_v29, %v1090_v60  ;;  %v3477_v60 = vld [vmem:[#allocation2 + $0x180] sm:$0xf] }
 0x19d   :  { %v1348_v21 = vmax.f32 %v1318_v13, 0.0  ;;  %v1188_v13 = vadd.f32 %v1187_v19, %v1139_v9  ;;  %v3735_v19 = vld [vmem:[#allocation2 + $0x19c] sm:$0xf0]  ;;  %v3736_v9 = vld [vmem:[#allocation2 + $0x1a4] sm:$0xf0] }
 0x1a0   :  { %v1270_v40 = vpop.f32.mrf.mxu2 }
 0x1a1   :  { %v1319_v12 = vpop.f32.mrf.mxu3  ;;  %v1271_v44 = vadd.f32 %v1270_v40, %v1222_v36  ;;  %v1236_v36 = vpop.f32.mrf.mxu1 }
 0x1a3   :  { %v1320_v26 = vadd.f32 %v1319_v12, %v1271_v44  ;;  %v1190_v44 = vpop.f32.mrf.mxu0 }
 0x1a5   :  { %v1349_v22 = vmax.f32 %v1320_v26, 0.0  ;;  %v1237_v26 = vadd.f32 %v1236_v36, %v1188_v13  ;;  %v3732_v36 = vld [vmem:[#allocation2 + $0x18c] sm:$0xf] }
 0x1a7   :  { %v1361_v25 = vpack.c.bf16 %v1349_v22, %v1348_v21 }
 0x1a8   :  { %v1273_v31 = vpop.f32.mrf.mxu2 }
 0x1a9   :  { %v1322_v32 = vpop.f32.mrf.mxu3  ;;  %1457 = vmatmul.bf16.gmra.mxu0 %v1361_v25  ;;  %v1274_v56 = vadd.f32 %v1273_v31, %v1225_v49  ;;  %v1239_v22 = vpop.f32.mrf.mxu1  ;;  %v1191_v31 = vadd.f32 %v1190_v44, %v4817_v34 }
 0x1ab   :  { %v1323_v62 = vadd.f32 %v1322_v32, %v1274_v56  ;;  %v1144_v32 = vadd.f32 %v4821_v39, %v1095_v24  ;;  %v1192_v38 = vpop.f32.mrf.mxu0  ;;  %v3509_v39 = vld [vmem:[#allocation2 + $0x1c0] sm:$0xf]  ;;  %v3453_v24 = vld [vmem:[#allocation2 + $0x148] sm:$0xf] }
 0x1ad   :  { %v1350_v45 = vmax.f32 %v1323_v62, 0.0  ;;  %v1193_v4 = vadd.f32 %v1192_v38, %v1144_v32 }
 0x1b0   :  { %v1275_v46 = vpop.f32.mrf.mxu2 }
 0x1b1   :  { %v1324_v51 = vpop.f32.mrf.mxu3  ;;  %v1276_v35 = vadd.f32 %v1275_v46, %v1227_v33  ;;  %v1240_v33 = vadd.f32 %v1239_v22, %v1191_v31  ;;  %v1241_v46 = vpop.f32.mrf.mxu1  ;;  %v3455_v31 = vld [vmem:[#allocation2 + $0x168] sm:$0xf0] }
 0x1b2   :  { %v1242_v62 = vadd.f32 %v1241_v46, %v1193_v4  ;;  %v3413_v4 = vld [vmem:[#allocation2 + $0x100] sm:$0xf] }
 0x1b3   :  { %v1325_v10 = vadd.f32 %v1324_v51, %v1276_v35  ;;  %v3719_v46 = vld [vmem:[#allocation2 + $0x11c] sm:$0xf0] }
 0x1b5   :  { %v1351_v48 = vmax.f32 %v1325_v10, 0.0 }
 0x1b7   :  { %v1362_v8 = vpack.c.bf16 %v1351_v48, %v1350_v45  ;;  %v3743_v48 = vld [vmem:[#allocation2 + $0x1dc] sm:$0xf0] }
 0x1b8   :  { %v1278_v57 = vpop.f32.mrf.mxu2  ;;  %v3510_v50 = vor.u32 %v3743_v48, %v3509_v39 }
 0x1b9   :  { %v1327_v58 = vpop.f32.mrf.mxu3  ;;  %1462 = vmatmul.bf16.gmra.mxu0 %v1362_v8  ;;  %v1279_v63 = vadd.f32 %v1278_v57, %v1230_v59  ;;  %v3511_v8 = vld [vmem:[#allocation2 + $0x1e0] sm:$0xf0]  ;;  %v3740_v59 = vld [vmem:[#allocation2 + $0x1cc] sm:$0xf] }
 0x1ba   :  { %v3514_v57 = vor.u32 %v3739_v52, %v3511_v8  ;;  %2050 = vmatpush.bf16.msrb.mxu2 %v3510_v50 }
 0x1bb   :  { %v1328_v15 = vadd.f32 %v1327_v58, %v1279_v63  ;;  %v3517_v58 = vld [vmem:[#allocation2 + $0x1c8] sm:$0xf]  ;;  %v3522_v63 = vor.u32 %v3740_v59, %v3519_v6  ;;  %v3707_v59 = vld [vmem:[#allocation2 + $0xc4] sm:$0xf] }
 0x1bc   :  { %v3518_v30 = vor.u32 %v3744_v17, %v3517_v58  ;;  %2099 = vmatpush.bf16.msrb.mxu3 %v3514_v57  ;;  %v3381_v57 = vld [vmem:[#allocation2 + $0xc0] sm:$0xf] }
 0x1bd   :  { %v1352_v1 = vmax.f32 %v1328_v15, 0.0  ;;  %2197 = vmatpush.bf16.msrb.mxu1 %v3522_v63  ;;  %v3711_v58 = vld [vmem:[#allocation2 + $0xdc] sm:$0xf0]  ;;  %v3389_v63 = vld [vmem:[#allocation2 + $0xc8] sm:$0xf] }
 0x1be   :  { %2148 = vmatpush.bf16.msrb.mxu0 %v3518_v30  ;;  %v3382_v17 = vor.u32 %v3711_v58, %v3381_v57  ;;  %v3383_v30 = vld [vmem:[#allocation2 + $0xe0] sm:$0xf0] }
 0x1bf   :  { %v3386_v6 = vor.u32 %v3707_v59, %v3383_v30  ;;  %v3525_v30 = vld [vmem:[#allocation2 + $0x1d0] sm:$0xf] }
 0x1c0   :  { %v1280_v55 = vpop.f32.mrf.mxu2 }
 0x1c1   :  { %v1329_v0 = vpop.f32.mrf.mxu3  ;;  %v1281_v3 = vadd.f32 %v1280_v55, %v1232_v5 }
 0x1c3   :  { %v1330_v7 = vadd.f32 %v1329_v0, %v1281_v3 }
 0x1c5   :  { %v1353_v14 = vmax.f32 %v1330_v7, 0.0  ;;  %v3478_v7 = vor.u32 %v3735_v19, %v3477_v60 }
 0x1c7   :  { %v1363_v42 = vpack.c.bf16 %v1353_v14, %v1352_v1  ;;  %v3731_v1 = vld [vmem:[#allocation2 + $0x184] sm:$0xf]  ;;  %2051 = vmatpush.bf16.msrb.mxu2 %v3478_v7 }
 0x1c8   :  { %v1283_v40 = vpop.f32.mrf.mxu2  ;;  %v3479_v14 = vld [vmem:[#allocation2 + $0x1a0] sm:$0xf0] }
 0x1c9   :  { %v1332_v12 = vpop.f32.mrf.mxu3  ;;  %1467 = vmatmul.bf16.gmra.mxu0 %v1363_v42  ;;  %v1284_v20 = vadd.f32 %v1283_v40, %v1235_v27  ;;  %v3482_v11 = vor.u32 %v3731_v1, %v3479_v14  ;;  %v3486_v42 = vor.u32 %v3736_v9, %v3485_v28  ;;  %v3487_v40 = vld [vmem:[#allocation2 + $0x1a8] sm:$0xf0]  ;;  %v3703_v28 = vld [vmem:[#allocation2 + $0x9c] sm:$0xf0] }
 0x1cb   :  { %v1333_v21 = vadd.f32 %v1332_v12, %v1284_v20  ;;  %2100 = vmatpush.bf16.msrb.mxu3 %v3482_v11  ;;  %v3490_v12 = vor.u32 %v3732_v36, %v3487_v40  ;;  %2149 = vmatpush.bf16.msrb.mxu0 %v3486_v42  ;;  %v3349_v11 = vld [vmem:[#allocation2 + $0x80] sm:$0xf]  ;;  %v3699_v36 = vld [vmem:[#allocation2 + $0x84] sm:$0xf] }
 0x1cc   :  { %v3350_v9 = vor.u32 %v3703_v28, %v3349_v11  ;;  %v3351_v42 = vld [vmem:[#allocation2 + $0xa0] sm:$0xf0]  ;;  %v3493_v11 = vld [vmem:[#allocation2 + $0x190] sm:$0xf] }
 0x1cd   :  { %v1354_v41 = vmax.f32 %v1333_v21, 0.0  ;;  %2198 = vmatpush.bf16.msrb.mxu1 %v3490_v12  ;;  %v3723_v21 = vld [vmem:[#allocation2 + $0x144] sm:$0xf]  ;;  %v3354_v40 = vor.u32 %v3699_v36, %v3351_v42  ;;  %v3357_v12 = vld [vmem:[#allocation2 + $0x88] sm:$0xf] }
 0x1ce   :  { %v3737_v28 = vld [vmem:[#allocation2 + $0x1ac] sm:$0xf0]  ;;  %v3495_v42 = vld [vmem:[#allocation2 + $0x1b0] sm:$0xf0] }
 0x1cf   :  { %v3494_v36 = vor.u32 %v3737_v28, %v3493_v11  ;;  %v3405_v11 = vld [vmem:[#allocation2 + $0xd8] sm:$0xf] }
 0x1d0   :  { %v1285_v16 = vpop.f32.mrf.mxu2  ;;  %v3714_v28 = vld [vmem:[#allocation2 + $0xf4] sm:$0xf0] }
 0x1d1   :  { %v1334_v18 = vpop.f32.mrf.mxu3  ;;  %v1286_v29 = vadd.f32 %v1285_v16, %v1237_v26  ;;  %v3445_v26 = vld [vmem:[#allocation2 + $0x140] sm:$0xf] }
 0x1d2   :  { %v3727_v16 = vld [vmem:[#allocation2 + $0x15c] sm:$0xf0] }
 0x1d3   :  { %v1335_v37 = vadd.f32 %v1334_v18, %v1286_v29  ;;  %v3446_v18 = vor.u32 %v3727_v16, %v3445_v26  ;;  %v3447_v29 = vld [vmem:[#allocation2 + $0x160] sm:$0xf0] }
 0x1d4   :  { %v3450_v22 = vor.u32 %v3723_v21, %v3447_v29 }
 0x1d5   :  { %v1355_v25 = vmax.f32 %v1335_v37, 0.0  ;;  %v3728_v37 = vld [vmem:[#allocation2 + $0x164] sm:$0xf0]  ;;  %2052 = vmatpush.bf16.msrb.mxu2 %v3446_v18 }
 0x1d6   :  { %2101 = vmatpush.bf16.msrb.mxu3 %v3450_v22  ;;  %v3317_v22 = vld [vmem:[#allocation2 + $0x40] sm:$0xf] }
 0x1d7   :  { %v1364_v49 = vpack.c.bf16 %v1355_v25, %v1354_v41  ;;  %v3724_v41 = vld [vmem:[#allocation2 + $0x14c] sm:$0xf]  ;;  %v3454_v25 = vor.u32 %v3728_v37, %v3453_v24  ;;  %v3695_v24 = vld [vmem:[#allocation2 + $0x5c] sm:$0xf0] }
 0x1d8   :  { %v1288_v2 = vpop.f32.mrf.mxu2  ;;  %v3458_v32 = vor.u32 %v3724_v41, %v3455_v31  ;;  %v3318_v37 = vor.u32 %v3695_v24, %v3317_v22  ;;  %v3691_v41 = vld [vmem:[#allocation2 + $0x44] sm:$0xf] }
 0x1d9   :  { %v1337_v56 = vpop.f32.mrf.mxu3  ;;  %1472 = vmatmul.bf16.gmra.mxu0 %v1364_v49  ;;  %v1289_v51 = vadd.f32 %v1288_v2, %v1240_v33 }
 0x1da   :  { %2150 = vmatpush.bf16.msrb.mxu0 %v3454_v25  ;;  %2199 = vmatpush.bf16.msrb.mxu1 %v3458_v32  ;;  %v3319_v25 = vld [vmem:[#allocation2 + $0x60] sm:$0xf0]  ;;  %v3325_v32 = vld [vmem:[#allocation2 + $0x48] sm:$0xf] }
 0x1db   :  { %v1338_v47 = vadd.f32 %v1337_v56, %v1289_v51  ;;  %v3414_v51 = vor.u32 %v3719_v46, %v3413_v4  ;;  %v3322_v31 = vor.u32 %v3691_v41, %v3319_v25  ;;  %v3687_v4 = vld [vmem:[#allocation2 + $0x1c] sm:$0xf0]  ;;  %v3461_v41 = vld [vmem:[#allocation2 + $0x150] sm:$0xf] }
 0x1dc   :  { %v3729_v25 = vld [vmem:[#allocation2 + $0x16c] sm:$0xf0] }
 0x1dd   :  { %v1356_v10 = vmax.f32 %v1338_v47, 0.0  ;;  %2053 = vmatpush.bf16.msrb.mxu2 %v3414_v51 }
 0x1e0   :  { %v1290_v35 = vpop.f32.mrf.mxu2 }
 0x1e1   :  { %v1291_v23 = vadd.f32 %v1290_v35, %v1242_v62  ;;  %v1339_v53 = vpop.f32.mrf.mxu3  ;;  %v3715_v62 = vld [vmem:[#allocation2 + $0x104] sm:$0xf]  ;;  %2054 = vmatpush.bf16.msrb.mxu2 %v3382_v17 }
 0x1e2   :  { %v3415_v35 = vld [vmem:[#allocation2 + $0x120] sm:$0xf0] }
 0x1e3   :  { %v1340_v43 = vadd.f32 %v1339_v53, %v1291_v23  ;;  %v3418_v47 = vor.u32 %v3715_v62, %v3415_v35  ;;  %v3421_v23 = vld [vmem:[#allocation2 + $0x108] sm:$0xf]  ;;  %v3683_v62 = vld [vmem:[#allocation2 + $0x4] sm:$0xf] }
 0x1e4   :  { %v3720_v53 = vld [vmem:[#allocation2 + $0x124] sm:$0xf0]  ;;  %v3287_v35 = vld [vmem:[#allocation2 + $0x20] sm:$0xf0] }
 0x1e5   :  { %v1357_v45 = vmax.f32 %v1340_v43, 0.0  ;;  %v3716_v43 = vld [vmem:[#allocation2 + $0x10c] sm:$0xf]  ;;  %2102 = vmatpush.bf16.msrb.mxu3 %v3418_v47  ;;  %2055 = vmatpush.bf16.msrb.mxu2 %v3350_v9  ;;  %v3733_v9 = vld [vmem:[#allocation2 + $0x194] sm:$0xf] }
 0x1e7   :  { %v1365_v34 = vpack.c.bf16 %v1357_v45, %v1356_v10  ;;  %v3422_v10 = vor.u32 %v3720_v53, %v3421_v23  ;;  %v3423_v45 = vld [vmem:[#allocation2 + $0x128] sm:$0xf0]  ;;  %v3290_v23 = vor.u32 %v3683_v62, %v3287_v35 }
 0x1e9   :  { %1477 = vmatmul.bf16.gmra.mxu0 %v1365_v34  ;;  %v3426_v34 = vor.u32 %v3716_v43, %v3423_v45  ;;  %2103 = vmatpush.bf16.msrb.mxu3 %v3386_v6  ;;  %v3745_v6 = vld [vmem:[#allocation2 + $0x1ec] sm:$0xf0] }
 0x1ea   :  { %2151 = vmatpush.bf16.msrb.mxu0 %v3422_v10  ;;  %2056 = vmatpush.bf16.msrb.mxu2 %v3318_v37 }
 0x1eb   :  { %2200 = vmatpush.bf16.msrb.mxu1 %v3426_v34  ;;  %v3293_v34 = vld [vmem:[#allocation2 + $0x8] sm:$0xf] }
 0x1ed   :  { %2104 = vmatpush.bf16.msrb.mxu3 %v3354_v40  ;;  %v3498_v40 = vor.u32 %v3733_v9, %v3495_v42  ;;  %v3406_v9 = vor.u32 %v3714_v28, %v3405_v11  ;;  %v3407_v42 = vld [vmem:[#allocation2 + $0xf8] sm:$0xf0] }
 0x1ee   :  { %v3686_v11 = vld [vmem:[#allocation2 + $0x1c] sm:$0xf] }
 0x1ef   :  { %v3311_v28 = vld [vmem:[#allocation2 + $0x38] sm:$0xf0] }
 0x1f1   :  { %2105 = vmatpush.bf16.msrb.mxu3 %v3322_v31  ;;  %v3725_v31 = vld [vmem:[#allocation2 + $0x154] sm:$0xf] }
 0x1f5   :  { %2106 = vmatpush.bf16.msrb.mxu3 %v3290_v23 }
 0x1f6   :  { %v1443_v5 = vpop.f32.mrf.mxu0 }
 0x1f7   :  { %v1444_v55 = vadd.f32 %v4874_v54, %v1443_v5  ;;  %v3712_v5 = vld [vmem:[#allocation2 + $0xe4] sm:$0xf0] }
 0x1f9   :  { %1483 = vst [vmem:[%s5591_s9] sm:$0xff] %v1444_v55 }
 0x1fe   :  { %v1445_v0 = vpop.f32.mrf.mxu0 }
 0x1ff   :  { %v1446_v15 = vadd.f32 %v4874_v54, %v1445_v0  ;;  %v3390_v0 = vor.u32 %v3712_v5, %v3389_v63  ;;  %v3741_v63 = vld [vmem:[#allocation2 + $0x1d4] sm:$0xf] }
 0x201   :  { %1484 = vst [vmem:[%s5591_s9 + $0x8] sm:$0xff] %v1446_v15  ;;  %v1499_v3 = vpack.c.bf16 %v1446_v15, %v1444_v55  ;;  %v3708_v55 = vld [vmem:[#allocation2 + $0xcc] sm:$0xf]  ;;  %2152 = vmatpush.bf16.msrb.mxu0 %v3390_v0  ;;  %v3527_v0 = vld [vmem:[#allocation2 + $0x1f0] sm:$0xf0] }
 0x202   :  { %v3391_v15 = vld [vmem:[#allocation2 + $0xe8] sm:$0xf0] }
 0x203   :  { %1583 = vmatmul.bf16.vlgmr.msra.gmra.mxu1 %v1499_v3  ;;  %v3394_v3 = vor.u32 %v3708_v55, %v3391_v15  ;;  %v3526_v55 = vor.u32 %v3745_v6, %v3525_v30  ;;  %v3530_v15 = vor.u32 %v3741_v63, %v3527_v0 }
 0x205   :  { %2201 = vmatpush.bf16.msrb.mxu1 %v3394_v3  ;;  %v3533_v3 = vld [vmem:[#allocation2 + $0x1d8] sm:$0xf]  ;;  %2295 = vmatpush.bf16.msra.mxu3 %v3530_v15 }
 0x206   :  { %v1448_v61 = vpop.f32.mrf.mxu0 }
 0x207   :  { %v1449_v27 = vadd.f32 %v4874_v54, %v1448_v61  ;;  %v3704_v61 = vld [vmem:[#allocation2 + $0xa4] sm:$0xf0] }
 0x209   :  { %1485 = vst [vmem:[%s5591_s9 + $0x10] sm:$0xff] %v1449_v27  ;;  %2296 = vmatpush.bf16.msra.mxu3 %v3498_v40 }
 0x20e   :  { %v1450_v13 = vpop.f32.mrf.mxu0 }
 0x20f   :  { %v1451_v44 = vadd.f32 %v4874_v54, %v1450_v13  ;;  %v3358_v13 = vor.u32 %v3704_v61, %v3357_v12  ;;  %v4943_v12 = vld [vmem:[%s5588_s6] ss:$0 sm:$0xff]  ;;  %v3501_v61 = vld [vmem:[#allocation2 + $0x198] sm:$0xf] }
 0x211   :  { %1486 = vst [vmem:[%s5591_s9 + $0x18] sm:$0xff] %v1451_v44  ;;  %v1500_v20 = vpack.c.bf16 %v1451_v44, %v1449_v27  ;;  %v3700_v27 = vld [vmem:[#allocation2 + $0x8c] sm:$0xf]  ;;  %2153 = vmatpush.bf16.msrb.mxu0 %v3358_v13 }
 0x212   :  { %v3359_v44 = vld [vmem:[#allocation2 + $0xa8] sm:$0xf0] }
 0x213   :  { %1588 = vmatmul.bf16.gmra.mxu1 %v1500_v20  ;;  %v3362_v20 = vor.u32 %v3700_v27, %v3359_v44  ;;  %v3738_v27 = vld [vmem:[#allocation2 + $0x1b4] sm:$0xf0]  ;;  %v3734_v44 = vld [vmem:[#allocation2 + $0x19c] sm:$0xf] }
 0x214   :  { %v3502_v13 = vor.u32 %v3738_v27, %v3501_v61 }
 0x215   :  { %2202 = vmatpush.bf16.msrb.mxu1 %v3362_v20  ;;  %v3503_v20 = vld [vmem:[#allocation2 + $0x1b8] sm:$0xf0] }
 0x216   :  { %v1453_v38 = vpop.f32.mrf.mxu0 }
 0x217   :  { %v1454_v49 = vadd.f32 %v4874_v54, %v1453_v38  ;;  %v3696_v38 = vld [vmem:[#allocation2 + $0x64] sm:$0xf0] }
 0x219   :  { %1487 = vst [vmem:[%s5591_s9 + $0x20] sm:$0xff] %v1454_v49 }
 0x21e   :  { %v1455_v2 = vpop.f32.mrf.mxu0 }
 0x21f   :  { %v1456_v56 = vadd.f32 %v4874_v54, %v1455_v2  ;;  %v3326_v2 = vor.u32 %v3696_v38, %v3325_v32  ;;  %v3462_v32 = vor.u32 %v3729_v25, %v3461_v41  ;;  %v3463_v38 = vld [vmem:[#allocation2 + $0x170] sm:$0xf0]  ;;  %v3373_v25 = vld [vmem:[#allocation2 + $0x98] sm:$0xf] }
 0x221   :  { %1488 = vst [vmem:[%s5591_s9 + $0x28] sm:$0xff] %v1456_v56  ;;  %v1501_v33 = vpack.c.bf16 %v1456_v56, %v1454_v49  ;;  %v3692_v49 = vld [vmem:[#allocation2 + $0x4c] sm:$0xf]  ;;  %2154 = vmatpush.bf16.msrb.mxu0 %v3326_v2  ;;  %v3469_v2 = vld [vmem:[#allocation2 + $0x158] sm:$0xf] }
 0x222   :  { %v3327_v56 = vld [vmem:[#allocation2 + $0x68] sm:$0xf0] }
 0x223   :  { %1593 = vmatmul.bf16.gmra.mxu1 %v1501_v33  ;;  %v3285_v33 = vld [vmem:[#allocation2] sm:$0xf]  ;;  %v3330_v46 = vor.u32 %v3692_v49, %v3327_v56  ;;  %v3466_v49 = vor.u32 %v3725_v31, %v3463_v38  ;;  %v3730_v56 = vld [vmem:[#allocation2 + $0x174] sm:$0xf0]  ;;  %v3702_v38 = vld [vmem:[#allocation2 + $0x9c] sm:$0xf] }
 0x224   :  { %v3286_v51 = vor.u32 %v3687_v4, %v3285_v33  ;;  %v3470_v33 = vor.u32 %v3730_v56, %v3469_v2  ;;  %v3726_v4 = vld [vmem:[#allocation2 + $0x15c] sm:$0xf]  ;;  %v3706_v31 = vld [vmem:[#allocation2 + $0xb4] sm:$0xf0] }
 0x225   :  { %2203 = vmatpush.bf16.msrb.mxu1 %v3330_v46  ;;  %2297 = vmatpush.bf16.msra.mxu3 %v3466_v49  ;;  %v3471_v46 = vld [vmem:[#allocation2 + $0x178] sm:$0xf0] }
 0x226   :  { %v1458_v39 = vpop.f32.mrf.mxu0  ;;  %2057 = vmatpush.bf16.msrb.mxu2 %v3286_v51  ;;  %v3474_v51 = vor.u32 %v3726_v4, %v3471_v46  ;;  %v3375_v49 = vld [vmem:[#allocation2 + $0xb8] sm:$0xf0] }
 0x227   :  { %v1459_v48 = vadd.f32 %v4874_v54, %v1458_v39  ;;  %v3688_v39 = vld [vmem:[#allocation2 + $0x24] sm:$0xf0]  ;;  %v3378_v2 = vor.u32 %v3702_v38, %v3375_v49 }
 0x229   :  { %1489 = vst [vmem:[%s5591_s9 + $0x30] sm:$0xff] %v1459_v48 }
 0x22a   :  { %2246 = vmatpush.bf16.msra.mxu2 %v3526_v55 }
 0x22e   :  { %v1460_v52 = vpop.f32.mrf.mxu0  ;;  %2247 = vmatpush.bf16.msra.mxu2 %v3494_v36  ;;  %v3710_v36 = vld [vmem:[#allocation2 + $0xdc] sm:$0xf] }
 0x22f   :  { %v1461_v50 = vadd.f32 %v4874_v54, %v1460_v52  ;;  %v3294_v52 = vor.u32 %v3688_v39, %v3293_v34  ;;  %v3721_v34 = vld [vmem:[#allocation2 + $0x12c] sm:$0xf0]  ;;  %v3717_v39 = vld [vmem:[#allocation2 + $0x114] sm:$0xf]  ;;  %v3410_v40 = vor.u32 %v3710_v36, %v3407_v42 }
 0x231   :  { %1490 = vst [vmem:[%s5591_s9 + $0x38] sm:$0xff] %v1461_v50  ;;  %v1502_v8 = vpack.c.bf16 %v1461_v50, %v1459_v48  ;;  %v3684_v48 = vld [vmem:[#allocation2 + $0xc] sm:$0xf]  ;;  %2155 = vmatpush.bf16.msrb.mxu0 %v3294_v52  ;;  %v3431_v52 = vld [vmem:[#allocation2 + $0x130] sm:$0xf0] }
 0x232   :  { %v3295_v50 = vld [vmem:[#allocation2 + $0x28] sm:$0xf0]  ;;  %2248 = vmatpush.bf16.msra.mxu2 %v3462_v32  ;;  %v3374_v32 = vor.u32 %v3706_v31, %v3373_v25 }
 0x233   :  { %1598 = vmatmul.bf16.gmra.mxu1 %v1502_v8  ;;  %v3298_v8 = vor.u32 %v3684_v48, %v3295_v50  ;;  %v3434_v50 = vor.u32 %v3717_v39, %v3431_v52  ;;  %v3341_v39 = vld [vmem:[#allocation2 + $0x58] sm:$0xf] }
 0x235   :  { %2204 = vmatpush.bf16.msrb.mxu1 %v3298_v8  ;;  %v3437_v8 = vld [vmem:[#allocation2 + $0x118] sm:$0xf]  ;;  %2298 = vmatpush.bf16.msra.mxu3 %v3434_v50  ;;  %v3694_v50 = vld [vmem:[#allocation2 + $0x5c] sm:$0xf] }
 0x236   :  { %v1463_v60 = vpop.f32.mrf.mxu0 }
 0x237   :  { %v1464_v19 = vadd.f32 %v4874_v54, %v1463_v60  ;;  %v3746_v60 = vld [vmem:[#allocation2 + $0x1f4] sm:$0xf0] }
 0x239   :  { %1491 = vst [vmem:[%s5591_s9 + $0x40] sm:$0xff] %v1464_v19 }
 0x23e   :  { %v1465_v7 = vpop.f32.mrf.mxu0 }
 0x23f   :  { %v1466_v1 = vadd.f32 %v4874_v54, %v1465_v7  ;;  %v3534_v7 = vor.u32 %v3746_v60, %v3533_v3  ;;  %v3397_v60 = vld [vmem:[#allocation2 + $0xd0] sm:$0xf] }
 0x241   :  { %1492 = vst [vmem:[%s5591_s9 + $0x48] sm:$0xff] %v1466_v1  ;;  %v1503_v14 = vpack.c.bf16 %v1466_v1, %v1464_v19  ;;  %v3742_v19 = vld [vmem:[#allocation2 + $0x1dc] sm:$0xf]  ;;  %2344 = vmatpush.bf16.msra.mxu0 %v3534_v7  ;;  %v3709_v7 = vld [vmem:[#allocation2 + $0xd4] sm:$0xf] }
 0x242   :  { %v3535_v1 = vld [vmem:[#allocation2 + $0x1f8] sm:$0xf0] }
 0x243   :  { %1603 = vmatmul.bf16.gmra.mxu1 %v1503_v14 }
 0x245   :  { %2345 = vmatpush.bf16.msra.mxu0 %v3502_v13 }
 0x246   :  { %v1468_v26 = vpop.f32.mrf.mxu0 }
 0x247   :  { %v1469_v16 = vadd.f32 %v4874_v54, %v1468_v26  ;;  %v3506_v26 = vor.u32 %v3734_v44, %v3503_v20 }
 0x249   :  { %1493 = vst [vmem:[%s5591_s9 + $0x50] sm:$0xff] %v1469_v16  ;;  %2346 = vmatpush.bf16.msra.mxu0 %v3470_v33 }
 0x24e   :  { %v1470_v18 = vpop.f32.mrf.mxu0 }
 0x24f   :  { %v1471_v21 = vadd.f32 %v4874_v54, %v1470_v18 }
 0x251   :  { %1494 = vst [vmem:[%s5591_s9 + $0x58] sm:$0xff] %v1471_v21  ;;  %v1504_v29 = vpack.c.bf16 %v1471_v21, %v1469_v16 }
 0x253   :  { %1608 = vmatmul.bf16.gmra.mxu1 %v1504_v29 }
 0x256   :  { %v1473_v47 = vpop.f32.mrf.mxu0 }
 0x257   :  { %v1474_v53 = vadd.f32 %v4874_v54, %v1473_v47 }
 0x259   :  { %1495 = vst [vmem:[%s5591_s9 + $0x60] sm:$0xff] %v1474_v53 }
 0x25e   :  { %v1475_v43 = vpop.f32.mrf.mxu0 }
 0x25f   :  { %v1476_v10 = vadd.f32 %v4874_v54, %v1475_v43 }
 0x261   :  { %1496 = vst [vmem:[%s5591_s9 + $0x68] sm:$0xff] %v1476_v10  ;;  %v1505_v45 = vpack.c.bf16 %v1476_v10, %v1474_v53 }
 0x263   :  { %1613 = vmatmul.bf16.gmra.mxu1 %v1505_v45  ;;  %v3429_v45 = vld [vmem:[#allocation2 + $0x110] sm:$0xf] }
 0x264   :  { %v3430_v48 = vor.u32 %v3721_v34, %v3429_v45  ;;  %v3335_v45 = vld [vmem:[#allocation2 + $0x70] sm:$0xf0] }
 0x266   :  { %v1478_v57 = vpop.f32.mrf.mxu0  ;;  %2249 = vmatpush.bf16.msra.mxu2 %v3430_v48  ;;  %v3698_v48 = vld [vmem:[#allocation2 + $0x74] sm:$0xf0] }
 0x267   :  { %v1479_v58 = vadd.f32 %v4874_v54, %v1478_v57  ;;  %v3722_v57 = vld [vmem:[#allocation2 + $0x134] sm:$0xf0]  ;;  %v3342_v52 = vor.u32 %v3698_v48, %v3341_v39 }
 0x269   :  { %1497 = vst [vmem:[%s5591_s9 + $0x70] sm:$0xff] %v1479_v58 }
 0x26e   :  { %v1480_v17 = vpop.f32.mrf.mxu0 }
 0x26f   :  { %v1481_v59 = vadd.f32 %v4874_v54, %v1480_v17  ;;  %v3538_v54 = vor.u32 %v3742_v19, %v3535_v1  ;;  %v3718_v17 = vld [vmem:[#allocation2 + $0x11c] sm:$0xf]  ;;  %v3713_v19 = vld [vmem:[#allocation2 + $0xec] sm:$0xf0] }
 0x270   :  { %v3398_v1 = vor.u32 %v3713_v19, %v3397_v60  ;;  %v3303_v19 = vld [vmem:[#allocation2 + $0x30] sm:$0xf0] }
 0x271   :  { %1498 = vst [vmem:[%s5591_s9 + $0x78] sm:$0xff] %v1481_v59  ;;  %v1506_v5 = vpack.c.bf16 %v1481_v59, %v1479_v58  ;;  %2393 = vmatpush.bf16.msra.mxu1 %v3538_v54  ;;  %v3438_v58 = vor.u32 %v3722_v57, %v3437_v8  ;;  %v3439_v59 = vld [vmem:[#allocation2 + $0x138] sm:$0xf0]  ;;  %v3399_v54 = vld [vmem:[#allocation2 + $0xf0] sm:$0xf0] }
 0x272   :  { %v3442_v30 = vor.u32 %v3718_v17, %v3439_v59  ;;  %2250 = vmatpush.bf16.msra.mxu2 %v3398_v1  ;;  %v3343_v8 = vld [vmem:[#allocation2 + $0x78] sm:$0xf0]  ;;  %v3690_v1 = vld [vmem:[#allocation2 + $0x34] sm:$0xf0] }
 0x273   :  { %1618 = vmatmul.bf16.gmra.mxu1 %v1506_v5  ;;  %2347 = vmatpush.bf16.msra.mxu0 %v3438_v58  ;;  %v3346_v57 = vor.u32 %v3694_v50, %v3343_v8 }
 0x275   :  { %2394 = vmatpush.bf16.msra.mxu1 %v3506_v26 }
 0x277   :  { %2348 = vmatpush.bf16.msra.mxu0 %v3406_v9  ;;  %v3314_v9 = vor.u32 %v3686_v11, %v3311_v28 }
 0x279   :  { %2395 = vmatpush.bf16.msra.mxu1 %v3474_v51 }
 0x27b   :  { %2349 = vmatpush.bf16.msra.mxu0 %v3374_v32 }
 0x27d   :  { %2396 = vmatpush.bf16.msra.mxu1 %v3442_v30 }
 0x27f   :  { %2350 = vmatpush.bf16.msra.mxu0 %v3342_v52 }
 0x280   :  { %v1584_v14 = vpop.f32.mrf.mxu1 }
 0x281   :  { %v1585_v16 = vadd.f32 %v4943_v12, %v1584_v14  ;;  %v3402_v14 = vor.u32 %v3709_v7, %v3399_v54  ;;  %2397 = vmatpush.bf16.msra.mxu1 %v3410_v40  ;;  %v3309_v7 = vld [vmem:[#allocation2 + $0x18] sm:$0xf] }
 0x283   :  { %v1624_v29 = vmax.f32 %v1585_v16, 0.0  ;;  %2299 = vmatpush.bf16.msra.mxu3 %v3402_v14  ;;  %v3310_v14 = vor.u32 %v3690_v1, %v3309_v7 }
 0x285   :  { %2398 = vmatpush.bf16.msra.mxu1 %v3378_v2  ;;  %2351 = vmatpush.bf16.msra.mxu0 %v3310_v14 }
 0x288   :  { %v1586_v18 = vpop.f32.mrf.mxu1 }
 0x289   :  { %v1587_v21 = vadd.f32 %v4943_v12, %v1586_v18  ;;  %v3365_v18 = vld [vmem:[#allocation2 + $0x90] sm:$0xf]  ;;  %2399 = vmatpush.bf16.msra.mxu1 %v3346_v57 }
 0x28b   :  { %v1625_v22 = vmax.f32 %v1587_v21, 0.0  ;;  %v3705_v21 = vld [vmem:[#allocation2 + $0xac] sm:$0xf0] }
 0x28d   :  { %v4947_v24 = vpack.c.bf16 %v1625_v22, %v1624_v29  ;;  %v3701_v29 = vld [vmem:[#allocation2 + $0x94] sm:$0xf]  ;;  %v3366_v22 = vor.u32 %v3705_v21, %v3365_v18  ;;  %2400 = vmatpush.bf16.msra.mxu1 %v3314_v9 }
 0x28f   :  { %2058 = vmatmul.bf16.vlgmr.msrb.gmra.mxu2 %v4947_v24  ;;  %2107 = vmatmul.bf16.vlgmr.msrb.gmra.mxu3 %v4947_v24 }
 0x290   :  { %2156 = vmatmul.bf16.vlgmr.msrb.gmra.mxu0 %v4947_v24  ;;  %2205 = vmatmul.bf16.vlgmr.msrb.gmra.mxu1 %v4947_v24  ;;  %v1589_v37 = vpop.f32.mrf.mxu1 }
 0x291   :  { %v1590_v62 = vadd.f32 %v4943_v12, %v1589_v37  ;;  %v3367_v37 = vld [vmem:[#allocation2 + $0xb0] sm:$0xf0]  ;;  %2251 = vmatpush.bf16.msra.mxu2 %v3366_v22 }
 0x292   :  { %v3370_v41 = vor.u32 %v3701_v29, %v3367_v37  ;;  %v5012_v37 = vld [vmem:[%s5590_s8] sm:$0xff] }
 0x293   :  { %v1626_v23 = vmax.f32 %v1590_v62, 0.0  ;;  %v5025_v49 = vperm.slane %v5012_v37, 0  ;;  %v5028_v2 = vperm.slane %v5012_v37, 1 }
 0x294   :  { %2300 = vmatpush.bf16.msra.mxu3 %v3370_v41  ;;  %v5015_v41 = vperm.slane %v5012_v37, 2 }
 0x298   :  { %v1591_v35 = vpop.f32.mrf.mxu1 }
 0x299   :  { %v1592_v47 = vadd.f32 %v4943_v12, %v1591_v35 }
 0x29b   :  { %v1627_v53 = vmax.f32 %v1592_v47, 0.0  ;;  %v3333_v47 = vld [vmem:[#allocation2 + $0x50] sm:$0xf] }
 0x29d   :  { %v4955_v43 = vpack.c.bf16 %v1627_v53, %v1626_v23  ;;  %v3697_v23 = vld [vmem:[#allocation2 + $0x6c] sm:$0xf0]  ;;  %v3693_v53 = vld [vmem:[#allocation2 + $0x54] sm:$0xf] }
 0x29e   :  { %v3338_v34 = vor.u32 %v3693_v53, %v3335_v45 }
 0x29f   :  { %2063 = vmatmul.bf16.gmra.mxu2 %v4955_v43  ;;  %2112 = vmatmul.bf16.gmra.mxu3 %v4955_v43 }
 0x2a0   :  { %2161 = vmatmul.bf16.gmra.mxu0 %v4955_v43  ;;  %2210 = vmatmul.bf16.gmra.mxu1 %v4955_v43  ;;  %v1594_v10 = vpop.f32.mrf.mxu1 }
 0x2a1   :  { %v1595_v6 = vadd.f32 %v4943_v12, %v1594_v10  ;;  %v3334_v10 = vor.u32 %v3697_v23, %v3333_v47  ;;  %2301 = vmatpush.bf16.msra.mxu3 %v3338_v34 }
 0x2a3   :  { %v1628_v55 = vmax.f32 %v1595_v6, 0.0  ;;  %2252 = vmatpush.bf16.msra.mxu2 %v3334_v10 }
 0x2a8   :  { %v1596_v63 = vpop.f32.mrf.mxu1 }
 0x2a9   :  { %v1597_v5 = vadd.f32 %v4943_v12, %v1596_v63 }
 0x2ab   :  { %v1629_v0 = vmax.f32 %v1597_v5, 0.0 }
 0x2ad   :  { %v4963_v15 = vpack.c.bf16 %v1629_v0, %v1628_v55  ;;  %v3301_v55 = vld [vmem:[#allocation2 + $0x10] sm:$0xf] }
 0x2ae   :  { %v3689_v0 = vld [vmem:[#allocation2 + $0x2c] sm:$0xf0] }
 0x2af   :  { %2068 = vmatmul.bf16.gmra.mxu2 %v4963_v15  ;;  %2117 = vmatmul.bf16.gmra.mxu3 %v4963_v15  ;;  %v3302_v60 = vor.u32 %v3689_v0, %v3301_v55 }
 0x2b0   :  { %2166 = vmatmul.bf16.gmra.mxu0 %v4963_v15  ;;  %2215 = vmatmul.bf16.gmra.mxu1 %v4963_v15  ;;  %v1599_v3 = vpop.f32.mrf.mxu1 }
 0x2b1   :  { %v1600_v61 = vadd.f32 %v4943_v12, %v1599_v3  ;;  %v3685_v3 = vld [vmem:[#allocation2 + $0x14] sm:$0xf]  ;;  %2253 = vmatpush.bf16.msra.mxu2 %v3302_v60 }
 0x2b2   :  { %v3306_v54 = vor.u32 %v3685_v3, %v3303_v19 }
 0x2b3   :  { %v1630_v44 = vmax.f32 %v1600_v61, 0.0 }
 0x2b4   :  { %2302 = vmatpush.bf16.msra.mxu3 %v3306_v54 }
 0x2b8   :  { %v1601_v27 = vpop.f32.mrf.mxu1 }
 0x2b9   :  { %v1602_v13 = vadd.f32 %v4943_v12, %v1601_v27 }
 0x2bb   :  { %v1631_v20 = vmax.f32 %v1602_v13, 0.0 }
 0x2bd   :  { %v4971_v26 = vpack.c.bf16 %v1631_v20, %v1630_v44 }
 0x2bf   :  { %2073 = vmatmul.bf16.gmra.mxu2 %v4971_v26  ;;  %2122 = vmatmul.bf16.gmra.mxu3 %v4971_v26 }
 0x2c0   :  { %2171 = vmatmul.bf16.gmra.mxu0 %v4971_v26  ;;  %2220 = vmatmul.bf16.gmra.mxu1 %v4971_v26  ;;  %v1604_v16 = vpop.f32.mrf.mxu1 }
 0x2c1   :  { %v1605_v56 = vadd.f32 %v4943_v12, %v1604_v16 }
 0x2c3   :  { %v1632_v46 = vmax.f32 %v1605_v56, 0.0 }
 0x2c8   :  { %v1606_v33 = vpop.f32.mrf.mxu1 }
 0x2c9   :  { %v1607_v4 = vadd.f32 %v4943_v12, %v1606_v33 }
 0x2cb   :  { %v1633_v51 = vmax.f32 %v1607_v4, 0.0 }
 0x2cd   :  { %v4979_v62 = vpack.c.bf16 %v1633_v51, %v1632_v46 }
 0x2cf   :  { %2078 = vmatmul.bf16.gmra.mxu2 %v4979_v62  ;;  %2127 = vmatmul.bf16.gmra.mxu3 %v4979_v62 }
 0x2d0   :  { %2176 = vmatmul.bf16.gmra.mxu0 %v4979_v62  ;;  %2225 = vmatmul.bf16.gmra.mxu1 %v4979_v62  ;;  %v1609_v35 = vpop.f32.mrf.mxu1 }
 0x2d1   :  { %v1610_v58 = vadd.f32 %v4943_v12, %v1609_v35 }
 0x2d3   :  { %v1634_v30 = vmax.f32 %v1610_v58, 0.0 }
 0x2d8   :  { %v1611_v17 = vpop.f32.mrf.mxu1 }
 0x2d9   :  { %v1612_v59 = vadd.f32 %v4943_v12, %v1611_v17 }
 0x2db   :  { %v1635_v6 = vmax.f32 %v1612_v59, 0.0 }
 0x2dd   :  { %v4987_v63 = vpack.c.bf16 %v1635_v6, %v1634_v30 }
 0x2df   :  { %2083 = vmatmul.bf16.gmra.mxu2 %v4987_v63  ;;  %2132 = vmatmul.bf16.gmra.mxu3 %v4987_v63 }
 0x2e0   :  { %2181 = vmatmul.bf16.gmra.mxu0 %v4987_v63  ;;  %2230 = vmatmul.bf16.gmra.mxu1 %v4987_v63  ;;  %v1614_v5 = vpop.f32.mrf.mxu1 }
 0x2e1   :  { %v1615_v36 = vadd.f32 %v4943_v12, %v1614_v5 }
 0x2e3   :  { %v1636_v61 = vmax.f32 %v1615_v36, 0.0 }
 0x2e8   :  { %v1616_v42 = vpop.f32.mrf.mxu1 }
 0x2e9   :  { %v1617_v40 = vadd.f32 %v4943_v12, %v1616_v42 }
 0x2eb   :  { %v1637_v27 = vmax.f32 %v1617_v40, 0.0 }
 0x2ed   :  { %v4995_v13 = vpack.c.bf16 %v1637_v27, %v1636_v61 }
 0x2ef   :  { %2088 = vmatmul.bf16.gmra.mxu2 %v4995_v13  ;;  %2137 = vmatmul.bf16.gmra.mxu3 %v4995_v13 }
 0x2f0   :  { %2186 = vmatmul.bf16.gmra.mxu0 %v4995_v13  ;;  %2235 = vmatmul.bf16.gmra.mxu1 %v4995_v13  ;;  %v1619_v44 = vpop.f32.mrf.mxu1 }
 0x2f1   :  { %v1620_v20 = vadd.f32 %v4943_v12, %v1619_v44 }
 0x2f3   :  { %v1638_v21 = vmax.f32 %v1620_v20, 0.0 }
 0x2f8   :  { %v1621_v16 = vpop.f32.mrf.mxu1 }
 0x2f9   :  { %v1622_v18 = vadd.f32 %v4943_v12, %v1621_v16  ;;  %v5018_v12 = vperm.slane %v5012_v37, 3 }
 0x2fb   :  { %v1639_v29 = vmax.f32 %v1622_v18, 0.0 }
 0x2fd   :  { %v5003_v22 = vpack.c.bf16 %v1639_v29, %v1638_v21 }
 0x2ff   :  { %2093 = vmatmul.bf16.gmra.mxu2 %v5003_v22  ;;  %2142 = vmatmul.bf16.gmra.mxu3 %v5003_v22 }
 0x300   :  { %2191 = vmatmul.bf16.gmra.mxu0 %v5003_v22  ;;  %2240 = vmatmul.bf16.gmra.mxu1 %v5003_v22 }
 0x30d   :  { %v2157_v25 = vpop.f32.mrf.mxu0  ;;  %v2206_v31 = vpop.f32.mrf.mxu1 }
 0x30e   :  { %v2158_v32 = vadd.f32 %v2157_v25, %v5015_v41  ;;  %v2207_v38 = vadd.f32 %v2206_v31, %v5018_v12 }
 0x30f   :  { %2254 = vmatmul.bf16.vlgmr.msra.gmra.mxu2 %v4947_v24  ;;  %2303 = vmatmul.bf16.vlgmr.msra.gmra.mxu3 %v4947_v24 }
 0x310   :  { %3769 = vtanh.f32 %v2158_v32  ;;  %2352 = vmatmul.bf16.vlgmr.msra.gmra.mxu0 %v4947_v24  ;;  %2401 = vmatmul.bf16.vlgmr.msra.gmra.mxu1 %v4947_v24 }
 0x311   :  { %3771 = vtanh.f32 %v2207_v38 }
 0x312   :  { %v2059_v56 = vpop.f32.mrf.mxu2  ;;  %v2108_v33 = vpop.f32.mrf.mxu3 }
 0x313   :  { %v2060_v4 = vadd.f32 %v2059_v56, %v5025_v49  ;;  %v2109_v46 = vadd.f32 %v2108_v33, %v5028_v2 }
 0x315   :  { %3773 = vtanh.f32 %v2060_v4  ;;  %v2159_v51 = vpop.f32.mrf.mxu0  ;;  %v2208_v35 = vpop.f32.mrf.mxu1 }
 0x316   :  { %v3770_v47 = vpop.eup %3769  ;;  %3775 = vtanh.f32 %v2109_v46  ;;  %v2160_v23 = vadd.f32 %v2159_v51, %v5015_v41  ;;  %v2209_v53 = vadd.f32 %v2208_v35, %v5018_v12 }
 0x317   :  { %v3772_v10 = vpop.eup %3771  ;;  %2572 = vst [vmem:[%s5592_s10 + $0x10] sm:$0xff] %v3770_v47 }
 0x318   :  { %2573 = vst [vmem:[%s5592_s10 + $0x18] sm:$0xff] %v3772_v10  ;;  %3777 = vtanh.f32 %v2160_v23 }
 0x319   :  { %3779 = vtanh.f32 %v2209_v53 }
 0x31a   :  { %v2061_v24 = vpop.f32.mrf.mxu2  ;;  %v2110_v45 = vpop.f32.mrf.mxu3 }
 0x31b   :  { %v3774_v34 = vpop.eup %3773  ;;  %v2062_v39 = vadd.f32 %v2061_v24, %v5025_v49  ;;  %v2111_v48 = vadd.f32 %v2110_v45, %v5028_v2 }
 0x31c   :  { %v3776_v52 = vpop.eup %3775  ;;  %2570 = vst [vmem:[%s5592_s10] sm:$0xff] %v3774_v34 }
 0x31d   :  { %2571 = vst [vmem:[%s5592_s10 + $0x8] sm:$0xff] %v3776_v52  ;;  %3781 = vtanh.f32 %v2062_v39  ;;  %v2162_v50 = vpop.f32.mrf.mxu0  ;;  %v2211_v8 = vpop.f32.mrf.mxu1 }
 0x31e   :  { %v3778_v57 = vpop.eup %3777  ;;  %3783 = vtanh.f32 %v2111_v48  ;;  %v2163_v58 = vadd.f32 %v2162_v50, %v5015_v41  ;;  %v2212_v17 = vadd.f32 %v2211_v8, %v5018_v12 }
 0x31f   :  { %v3780_v59 = vpop.eup %3779  ;;  %2580 = vst [vmem:[%s5592_s10 + $0x50] sm:$0xff] %v3778_v57  ;;  %2259 = vmatmul.bf16.gmra.mxu2 %v4955_v43  ;;  %2308 = vmatmul.bf16.gmra.mxu3 %v4955_v43 }
 0x320   :  { %2581 = vst [vmem:[%s5592_s10 + $0x58] sm:$0xff] %v3780_v59  ;;  %3785 = vtanh.f32 %v2163_v58  ;;  %2357 = vmatmul.bf16.gmra.mxu0 %v4955_v43  ;;  %2406 = vmatmul.bf16.gmra.mxu1 %v4955_v43 }
 0x321   :  { %3787 = vtanh.f32 %v2212_v17 }
 0x322   :  { %v2064_v30 = vpop.f32.mrf.mxu2  ;;  %v2113_v6 = vpop.f32.mrf.mxu3 }
 0x323   :  { %v3782_v5 = vpop.eup %3781  ;;  %v2065_v55 = vadd.f32 %v2064_v30, %v5025_v49  ;;  %v2114_v0 = vadd.f32 %v2113_v6, %v5028_v2 }
 0x324   :  { %v3784_v3 = vpop.eup %3783  ;;  %2578 = vst [vmem:[%s5592_s10 + $0x40] sm:$0xff] %v3782_v5 }
 0x325   :  { %2579 = vst [vmem:[%s5592_s10 + $0x48] sm:$0xff] %v3784_v3  ;;  %3789 = vtanh.f32 %v2065_v55  ;;  %v2164_v60 = vpop.f32.mrf.mxu0  ;;  %v2213_v43 = vpop.f32.mrf.mxu1 }
 0x326   :  { %v3786_v19 = vpop.eup %3785  ;;  %3791 = vtanh.f32 %v2114_v0  ;;  %v2165_v7 = vadd.f32 %v2164_v60, %v5015_v41  ;;  %v2214_v1 = vadd.f32 %v2213_v43, %v5018_v12 }
 0x327   :  { %v3788_v54 = vpop.eup %3787  ;;  %2588 = vst [vmem:[%s5592_s10 + $0x90] sm:$0xff] %v3786_v19 }
 0x328   :  { %2589 = vst [vmem:[%s5592_s10 + $0x98] sm:$0xff] %v3788_v54  ;;  %3793 = vtanh.f32 %v2165_v7 }
 0x329   :  { %3795 = vtanh.f32 %v2214_v1 }
 0x32a   :  { %v2066_v14 = vpop.f32.mrf.mxu2  ;;  %v2115_v11 = vpop.f32.mrf.mxu3 }
 0x32b   :  { %v3790_v28 = vpop.eup %3789  ;;  %v2067_v9 = vadd.f32 %v2066_v14, %v5025_v49  ;;  %v2116_v36 = vadd.f32 %v2115_v11, %v5028_v2 }
 0x32c   :  { %v3792_v42 = vpop.eup %3791  ;;  %2586 = vst [vmem:[%s5592_s10 + $0x80] sm:$0xff] %v3790_v28 }
 0x32d   :  { %2587 = vst [vmem:[%s5592_s10 + $0x88] sm:$0xff] %v3792_v42  ;;  %3797 = vtanh.f32 %v2067_v9  ;;  %v2167_v40 = vpop.f32.mrf.mxu0  ;;  %v2216_v61 = vpop.f32.mrf.mxu1 }
 0x32e   :  { %v3794_v27 = vpop.eup %3793  ;;  %3799 = vtanh.f32 %v2116_v36  ;;  %v2168_v44 = vadd.f32 %v2167_v40, %v5015_v41  ;;  %v2217_v20 = vadd.f32 %v2216_v61, %v5018_v12 }
 0x32f   :  { %v3796_v16 = vpop.eup %3795  ;;  %2596 = vst [vmem:[%s5592_s10 + $0xd0] sm:$0xff] %v3794_v27  ;;  %2264 = vmatmul.bf16.gmra.mxu2 %v4963_v15  ;;  %2313 = vmatmul.bf16.gmra.mxu3 %v4963_v15 }
 0x330   :  { %2597 = vst [vmem:[%s5592_s10 + $0xd8] sm:$0xff] %v3796_v16  ;;  %3801 = vtanh.f32 %v2168_v44  ;;  %2362 = vmatmul.bf16.gmra.mxu0 %v4963_v15  ;;  %2411 = vmatmul.bf16.gmra.mxu1 %v4963_v15 }
 0x331   :  { %3803 = vtanh.f32 %v2217_v20 }
 0x332   :  { %v2069_v18 = vpop.f32.mrf.mxu2  ;;  %v2118_v21 = vpop.f32.mrf.mxu3 }
 0x333   :  { %v3798_v29 = vpop.eup %3797  ;;  %v2070_v25 = vadd.f32 %v2069_v18, %v5025_v49  ;;  %v2119_v31 = vadd.f32 %v2118_v21, %v5028_v2 }
 0x334   :  { %v3800_v32 = vpop.eup %3799  ;;  %2594 = vst [vmem:[%s5592_s10 + $0xc0] sm:$0xff] %v3798_v29 }
 0x335   :  { %2595 = vst [vmem:[%s5592_s10 + $0xc8] sm:$0xff] %v3800_v32  ;;  %3805 = vtanh.f32 %v2070_v25  ;;  %v2169_v38 = vpop.f32.mrf.mxu0  ;;  %v2218_v15 = vpop.f32.mrf.mxu1 }
 0x336   :  { %v3802_v56 = vpop.eup %3801  ;;  %3807 = vtanh.f32 %v2119_v31  ;;  %v2170_v33 = vadd.f32 %v2169_v38, %v5015_v41  ;;  %v2219_v4 = vadd.f32 %v2218_v15, %v5018_v12 }
 0x337   :  { %v3804_v46 = vpop.eup %3803  ;;  %2604 = vst [vmem:[%s5592_s10 + $0x110] sm:$0xff] %v3802_v56 }
 0x338   :  { %2605 = vst [vmem:[%s5592_s10 + $0x118] sm:$0xff] %v3804_v46  ;;  %3809 = vtanh.f32 %v2170_v33 }
 0x339   :  { %3811 = vtanh.f32 %v2219_v4 }
 0x33a   :  { %v2071_v51 = vpop.f32.mrf.mxu2  ;;  %v2120_v35 = vpop.f32.mrf.mxu3 }
 0x33b   :  { %v3806_v47 = vpop.eup %3805  ;;  %v2072_v23 = vadd.f32 %v2071_v51, %v5025_v49  ;;  %v2121_v53 = vadd.f32 %v2120_v35, %v5028_v2 }
 0x33c   :  { %v3808_v10 = vpop.eup %3807  ;;  %2602 = vst [vmem:[%s5592_s10 + $0x100] sm:$0xff] %v3806_v47 }
 0x33d   :  { %2603 = vst [vmem:[%s5592_s10 + $0x108] sm:$0xff] %v3808_v10  ;;  %3813 = vtanh.f32 %v2072_v23  ;;  %v2172_v24 = vpop.f32.mrf.mxu0  ;;  %v2221_v45 = vpop.f32.mrf.mxu1 }
 0x33e   :  { %v3810_v34 = vpop.eup %3809  ;;  %3815 = vtanh.f32 %v2121_v53  ;;  %v2173_v39 = vadd.f32 %v2172_v24, %v5015_v41  ;;  %v2222_v48 = vadd.f32 %v2221_v45, %v5018_v12 }
 0x33f   :  { %v3812_v52 = vpop.eup %3811  ;;  %2612 = vst [vmem:[%s5592_s10 + $0x150] sm:$0xff] %v3810_v34  ;;  %2269 = vmatmul.bf16.gmra.mxu2 %v4971_v26  ;;  %2318 = vmatmul.bf16.gmra.mxu3 %v4971_v26 }
 0x340   :  { %2613 = vst [vmem:[%s5592_s10 + $0x158] sm:$0xff] %v3812_v52  ;;  %3817 = vtanh.f32 %v2173_v39  ;;  %2367 = vmatmul.bf16.gmra.mxu0 %v4971_v26  ;;  %2416 = vmatmul.bf16.gmra.mxu1 %v4971_v26 }
 0x341   :  { %3819 = vtanh.f32 %v2222_v48 }
 0x342   :  { %v2074_v50 = vpop.f32.mrf.mxu2  ;;  %v2123_v8 = vpop.f32.mrf.mxu3 }
 0x343   :  { %v3814_v57 = vpop.eup %3813  ;;  %v2075_v58 = vadd.f32 %v2074_v50, %v5025_v49  ;;  %v2124_v17 = vadd.f32 %v2123_v8, %v5028_v2 }
 0x344   :  { %v3816_v59 = vpop.eup %3815  ;;  %2610 = vst [vmem:[%s5592_s10 + $0x140] sm:$0xff] %v3814_v57 }
 0x345   :  { %2611 = vst [vmem:[%s5592_s10 + $0x148] sm:$0xff] %v3816_v59  ;;  %3821 = vtanh.f32 %v2075_v58  ;;  %v2174_v30 = vpop.f32.mrf.mxu0  ;;  %v2223_v26 = vpop.f32.mrf.mxu1 }
 0x346   :  { %v3818_v6 = vpop.eup %3817  ;;  %3823 = vtanh.f32 %v2124_v17  ;;  %v2175_v5 = vadd.f32 %v2174_v30, %v5015_v41  ;;  %v2224_v55 = vadd.f32 %v2223_v26, %v5018_v12 }
 0x347   :  { %v3820_v0 = vpop.eup %3819  ;;  %2620 = vst [vmem:[%s5592_s10 + $0x190] sm:$0xff] %v3818_v6 }
 0x348   :  { %2621 = vst [vmem:[%s5592_s10 + $0x198] sm:$0xff] %v3820_v0  ;;  %3825 = vtanh.f32 %v2175_v5 }
 0x349   :  { %3827 = vtanh.f32 %v2224_v55 }
 0x34a   :  { %v2076_v3 = vpop.f32.mrf.mxu2  ;;  %v2125_v60 = vpop.f32.mrf.mxu3 }
 0x34b   :  { %v3822_v43 = vpop.eup %3821  ;;  %v2077_v19 = vadd.f32 %v2076_v3, %v5025_v49  ;;  %v2126_v7 = vadd.f32 %v2125_v60, %v5028_v2 }
 0x34c   :  { %v3824_v1 = vpop.eup %3823  ;;  %2618 = vst [vmem:[%s5592_s10 + $0x180] sm:$0xff] %v3822_v43 }
 0x34d   :  { %2619 = vst [vmem:[%s5592_s10 + $0x188] sm:$0xff] %v3824_v1  ;;  %3829 = vtanh.f32 %v2077_v19  ;;  %v2177_v54 = vpop.f32.mrf.mxu0  ;;  %v2226_v14 = vpop.f32.mrf.mxu1 }
 0x34e   :  { %v3826_v11 = vpop.eup %3825  ;;  %3831 = vtanh.f32 %v2126_v7  ;;  %v2178_v28 = vadd.f32 %v2177_v54, %v5015_v41  ;;  %v2227_v9 = vadd.f32 %v2226_v14, %v5018_v12 }
 0x34f   :  { %v3828_v36 = vpop.eup %3827  ;;  %2628 = vst [vmem:[%s5592_s10 + $0x1d0] sm:$0xff] %v3826_v11  ;;  %2274 = vmatmul.bf16.gmra.mxu2 %v4979_v62  ;;  %2323 = vmatmul.bf16.gmra.mxu3 %v4979_v62 }
 0x350   :  { %2629 = vst [vmem:[%s5592_s10 + $0x1d8] sm:$0xff] %v3828_v36  ;;  %3833 = vtanh.f32 %v2178_v28  ;;  %2372 = vmatmul.bf16.gmra.mxu0 %v4979_v62  ;;  %2421 = vmatmul.bf16.gmra.mxu1 %v4979_v62 }
 0x351   :  { %3835 = vtanh.f32 %v2227_v9 }
 0x352   :  { %v2079_v42 = vpop.f32.mrf.mxu2  ;;  %v2128_v40 = vpop.f32.mrf.mxu3 }
 0x353   :  { %v3830_v61 = vpop.eup %3829  ;;  %v2080_v27 = vadd.f32 %v2079_v42, %v5025_v49  ;;  %v2129_v44 = vadd.f32 %v2128_v40, %v5028_v2 }
 0x354   :  { %v3832_v20 = vpop.eup %3831  ;;  %2626 = vst [vmem:[%s5592_s10 + $0x1c0] sm:$0xff] %v3830_v61 }
 0x355   :  { %2627 = vst [vmem:[%s5592_s10 + $0x1c8] sm:$0xff] %v3832_v20  ;;  %3837 = vtanh.f32 %v2080_v27  ;;  %v2179_v16 = vpop.f32.mrf.mxu0  ;;  %v2228_v62 = vpop.f32.mrf.mxu1 }
 0x356   :  { %v3834_v18 = vpop.eup %3833  ;;  %3839 = vtanh.f32 %v2129_v44  ;;  %v2180_v21 = vadd.f32 %v2179_v16, %v5015_v41  ;;  %v2229_v29 = vadd.f32 %v2228_v62, %v5018_v12 }
 0x357   :  { %v3836_v25 = vpop.eup %3835  ;;  %2636 = vst [vmem:[%s5592_s10 + $0x210] sm:$0xff] %v3834_v18 }
 0x358   :  { %2637 = vst [vmem:[%s5592_s10 + $0x218] sm:$0xff] %v3836_v25  ;;  %3841 = vtanh.f32 %v2180_v21 }
 0x359   :  { %3843 = vtanh.f32 %v2229_v29 }
 0x35a   :  { %v2081_v31 = vpop.f32.mrf.mxu2  ;;  %v2130_v32 = vpop.f32.mrf.mxu3 }
 0x35b   :  { %v3838_v38 = vpop.eup %3837  ;;  %v2082_v15 = vadd.f32 %v2081_v31, %v5025_v49  ;;  %v2131_v56 = vadd.f32 %v2130_v32, %v5028_v2 }
 0x35c   :  { %v3840_v33 = vpop.eup %3839  ;;  %2634 = vst [vmem:[%s5592_s10 + $0x200] sm:$0xff] %v3838_v38 }
 0x35d   :  { %2635 = vst [vmem:[%s5592_s10 + $0x208] sm:$0xff] %v3840_v33  ;;  %3845 = vtanh.f32 %v2082_v15  ;;  %v2182_v4 = vpop.f32.mrf.mxu0  ;;  %v2231_v46 = vpop.f32.mrf.mxu1 }
 0x35e   :  { %v3842_v51 = vpop.eup %3841  ;;  %3847 = vtanh.f32 %v2131_v56  ;;  %v2183_v35 = vadd.f32 %v2182_v4, %v5015_v41  ;;  %v2232_v47 = vadd.f32 %v2231_v46, %v5018_v12 }
 0x35f   :  { %v3844_v23 = vpop.eup %3843  ;;  %2644 = vst [vmem:[%s5592_s10 + $0x250] sm:$0xff] %v3842_v51  ;;  %2279 = vmatmul.bf16.gmra.mxu2 %v4987_v63  ;;  %2328 = vmatmul.bf16.gmra.mxu3 %v4987_v63 }
 0x360   :  { %2645 = vst [vmem:[%s5592_s10 + $0x258] sm:$0xff] %v3844_v23  ;;  %3849 = vtanh.f32 %v2183_v35  ;;  %2377 = vmatmul.bf16.gmra.mxu0 %v4987_v63  ;;  %2426 = vmatmul.bf16.gmra.mxu1 %v4987_v63 }
 0x361   :  { %3851 = vtanh.f32 %v2232_v47 }
 0x362   :  { %v2084_v53 = vpop.f32.mrf.mxu2  ;;  %v2133_v10 = vpop.f32.mrf.mxu3 }
 0x363   :  { %v3846_v24 = vpop.eup %3845  ;;  %v2085_v45 = vadd.f32 %v2084_v53, %v5025_v49  ;;  %v2134_v34 = vadd.f32 %v2133_v10, %v5028_v2 }
 0x364   :  { %v3848_v39 = vpop.eup %3847  ;;  %2642 = vst [vmem:[%s5592_s10 + $0x240] sm:$0xff] %v3846_v24 }
 0x365   :  { %2643 = vst [vmem:[%s5592_s10 + $0x248] sm:$0xff] %v3848_v39  ;;  %3853 = vtanh.f32 %v2085_v45  ;;  %v2184_v48 = vpop.f32.mrf.mxu0  ;;  %v2233_v63 = vpop.f32.mrf.mxu1  ;;  %v5295_v45 = vperm.slane %v5012_v37, 6 }
 0x366   :  { %v3850_v52 = vpop.eup %3849  ;;  %3855 = vtanh.f32 %v2134_v34  ;;  %v2185_v50 = vadd.f32 %v2184_v48, %v5015_v41  ;;  %v2234_v8 = vadd.f32 %v2233_v63, %v5018_v12 }
 0x367   :  { %v3852_v57 = vpop.eup %3851  ;;  %2652 = vst [vmem:[%s5592_s10 + $0x290] sm:$0xff] %v3850_v52 }
 0x368   :  { %2653 = vst [vmem:[%s5592_s10 + $0x298] sm:$0xff] %v3852_v57  ;;  %3857 = vtanh.f32 %v2185_v50 }
 0x369   :  { %3859 = vtanh.f32 %v2234_v8 }
 0x36a   :  { %v2086_v58 = vpop.f32.mrf.mxu2  ;;  %v2135_v17 = vpop.f32.mrf.mxu3 }
 0x36b   :  { %v3854_v59 = vpop.eup %3853  ;;  %v2087_v30 = vadd.f32 %v2086_v58, %v5025_v49  ;;  %v2136_v26 = vadd.f32 %v2135_v17, %v5028_v2  ;;  %v5317_v58 = vperm.slane %v5012_v37, 5 }
 0x36c   :  { %v3856_v6 = vpop.eup %3855  ;;  %2650 = vst [vmem:[%s5592_s10 + $0x280] sm:$0xff] %v3854_v59 }
 0x36d   :  { %2651 = vst [vmem:[%s5592_s10 + $0x288] sm:$0xff] %v3856_v6  ;;  %3861 = vtanh.f32 %v2087_v30  ;;  %v2187_v5 = vpop.f32.mrf.mxu0  ;;  %v2236_v55 = vpop.f32.mrf.mxu1 }
 0x36e   :  { %v3858_v0 = vpop.eup %3857  ;;  %3863 = vtanh.f32 %v2136_v26  ;;  %v2188_v3 = vadd.f32 %v2187_v5, %v5015_v41  ;;  %v2237_v60 = vadd.f32 %v2236_v55, %v5018_v12 }
 0x36f   :  { %v3860_v43 = vpop.eup %3859  ;;  %2660 = vst [vmem:[%s5592_s10 + $0x2d0] sm:$0xff] %v3858_v0  ;;  %2284 = vmatmul.bf16.gmra.mxu2 %v4995_v13  ;;  %2333 = vmatmul.bf16.gmra.mxu3 %v4995_v13 }
 0x370   :  { %2661 = vst [vmem:[%s5592_s10 + $0x2d8] sm:$0xff] %v3860_v43  ;;  %3865 = vtanh.f32 %v2188_v3  ;;  %2382 = vmatmul.bf16.gmra.mxu0 %v4995_v13  ;;  %2431 = vmatmul.bf16.gmra.mxu1 %v4995_v13 }
 0x371   :  { %3867 = vtanh.f32 %v2237_v60 }
 0x372   :  { %v2089_v19 = vpop.f32.mrf.mxu2  ;;  %v2138_v7 = vpop.f32.mrf.mxu3 }
 0x373   :  { %v3862_v1 = vpop.eup %3861  ;;  %v2090_v54 = vadd.f32 %v2089_v19, %v5025_v49  ;;  %v2139_v14 = vadd.f32 %v2138_v7, %v5028_v2 }
 0x374   :  { %v3864_v11 = vpop.eup %3863  ;;  %2658 = vst [vmem:[%s5592_s10 + $0x2c0] sm:$0xff] %v3862_v1 }
 0x375   :  { %2659 = vst [vmem:[%s5592_s10 + $0x2c8] sm:$0xff] %v3864_v11  ;;  %3869 = vtanh.f32 %v2090_v54  ;;  %v2189_v28 = vpop.f32.mrf.mxu0  ;;  %v2238_v13 = vpop.f32.mrf.mxu1 }
 0x376   :  { %v3866_v9 = vpop.eup %3865  ;;  %3871 = vtanh.f32 %v2139_v14  ;;  %v2190_v36 = vadd.f32 %v2189_v28, %v5015_v41  ;;  %v2239_v42 = vadd.f32 %v2238_v13, %v5018_v12 }
 0x377   :  { %v3868_v40 = vpop.eup %3867  ;;  %2668 = vst [vmem:[%s5592_s10 + $0x310] sm:$0xff] %v3866_v9 }
 0x378   :  { %2669 = vst [vmem:[%s5592_s10 + $0x318] sm:$0xff] %v3868_v40  ;;  %3873 = vtanh.f32 %v2190_v36 }
 0x379   :  { %3875 = vtanh.f32 %v2239_v42 }
 0x37a   :  { %v2091_v61 = vpop.f32.mrf.mxu2  ;;  %v2140_v27 = vpop.f32.mrf.mxu3 }
 0x37b   :  { %v3870_v44 = vpop.eup %3869  ;;  %v2092_v20 = vadd.f32 %v2091_v61, %v5025_v49  ;;  %v2141_v16 = vadd.f32 %v2140_v27, %v5028_v2 }
 0x37c   :  { %v3872_v62 = vpop.eup %3871  ;;  %2666 = vst [vmem:[%s5592_s10 + $0x300] sm:$0xff] %v3870_v44 }
 0x37d   :  { %2667 = vst [vmem:[%s5592_s10 + $0x308] sm:$0xff] %v3872_v62  ;;  %3877 = vtanh.f32 %v2092_v20  ;;  %v2192_v18 = vpop.f32.mrf.mxu0  ;;  %v2241_v21 = vpop.f32.mrf.mxu1 }
 0x37e   :  { %v3874_v29 = vpop.eup %3873  ;;  %3879 = vtanh.f32 %v2141_v16  ;;  %v2193_v25 = vadd.f32 %v2192_v18, %v5015_v41  ;;  %v2242_v31 = vadd.f32 %v2241_v21, %v5018_v12 }
 0x37f   :  { %v3876_v32 = vpop.eup %3875  ;;  %2676 = vst [vmem:[%s5592_s10 + $0x350] sm:$0xff] %v3874_v29  ;;  %2289 = vmatmul.bf16.gmra.mxu2 %v5003_v22  ;;  %2338 = vmatmul.bf16.gmra.mxu3 %v5003_v22 }
 0x380   :  { %2677 = vst [vmem:[%s5592_s10 + $0x358] sm:$0xff] %v3876_v32  ;;  %3881 = vtanh.f32 %v2193_v25  ;;  %2387 = vmatmul.bf16.gmra.mxu0 %v5003_v22  ;;  %2436 = vmatmul.bf16.gmra.mxu1 %v5003_v22 }
 0x381   :  { %3883 = vtanh.f32 %v2242_v31 }
 0x382   :  { %v2094_v38 = vpop.f32.mrf.mxu2  ;;  %v2143_v15 = vpop.f32.mrf.mxu3 }
 0x383   :  { %v3878_v56 = vpop.eup %3877  ;;  %v2095_v33 = vadd.f32 %v2094_v38, %v5025_v49  ;;  %v2144_v4 = vadd.f32 %v2143_v15, %v5028_v2 }
 0x384   :  { %v3880_v46 = vpop.eup %3879  ;;  %2674 = vst [vmem:[%s5592_s10 + $0x340] sm:$0xff] %v3878_v56 }
 0x385   :  { %2675 = vst [vmem:[%s5592_s10 + $0x348] sm:$0xff] %v3880_v46  ;;  %3885 = vtanh.f32 %v2095_v33  ;;  %v2194_v51 = vpop.f32.mrf.mxu0  ;;  %v2243_v22 = vpop.f32.mrf.mxu1 }
 0x386   :  { %v3882_v35 = vpop.eup %3881  ;;  %3887 = vtanh.f32 %v2144_v4  ;;  %v2195_v47 = vadd.f32 %v2194_v51, %v5015_v41  ;;  %v2244_v23 = vadd.f32 %v2243_v22, %v5018_v12  ;;  %v5298_v41 = vperm.slane %v5012_v37, 7 }
 0x387   :  { %v3884_v53 = vpop.eup %3883  ;;  %2684 = vst [vmem:[%s5592_s10 + $0x390] sm:$0xff] %v3882_v35 }
 0x388   :  { %2685 = vst [vmem:[%s5592_s10 + $0x398] sm:$0xff] %v3884_v53  ;;  %3889 = vtanh.f32 %v2195_v47 }
 0x389   :  { %3891 = vtanh.f32 %v2244_v23 }
 0x38a   :  { %v2096_v10 = vpop.f32.mrf.mxu2  ;;  %v2145_v24 = vpop.f32.mrf.mxu3 }
 0x38b   :  { %v3886_v12 = vpop.eup %3885  ;;  %v2097_v34 = vadd.f32 %v2096_v10, %v5025_v49  ;;  %v2146_v39 = vadd.f32 %v2145_v24, %v5028_v2  ;;  %v5314_v2 = vperm.slane %v5012_v37, 4 }
 0x38c   :  { %v3888_v48 = vpop.eup %3887  ;;  %2682 = vst [vmem:[%s5592_s10 + $0x380] sm:$0xff] %v3886_v12 }
 0x38d   :  { %2683 = vst [vmem:[%s5592_s10 + $0x388] sm:$0xff] %v3888_v48  ;;  %3893 = vtanh.f32 %v2097_v34  ;;  %v2353_v63 = vpop.f32.mrf.mxu0  ;;  %v2402_v52 = vpop.f32.mrf.mxu1 }
 0x38e   :  { %v3890_v50 = vpop.eup %3889  ;;  %3895 = vtanh.f32 %v2146_v39  ;;  %v2354_v8 = vadd.f32 %v2353_v63, %v5295_v45  ;;  %v2403_v49 = vadd.f32 %v2402_v52, %v5298_v41 }
 0x38f   :  { %v3892_v57 = vpop.eup %3891  ;;  %2692 = vst [vmem:[%s5592_s10 + $0x3d0] sm:$0xff] %v3890_v50 }
 0x390   :  { %2693 = vst [vmem:[%s5592_s10 + $0x3d8] sm:$0xff] %v3892_v57  ;;  %3897 = vtanh.f32 %v2354_v8 }
 0x391   :  { %3899 = vtanh.f32 %v2403_v49 }
 0x392   :  { %v2255_v17 = vpop.f32.mrf.mxu2  ;;  %v2304_v59 = vpop.f32.mrf.mxu3 }
 0x393   :  { %v3894_v30 = vpop.eup %3893  ;;  %v2256_v26 = vadd.f32 %v2255_v17, %v5314_v2  ;;  %v2305_v6 = vadd.f32 %v2304_v59, %v5317_v58 }
 0x394   :  { %v3896_v5 = vpop.eup %3895  ;;  %2690 = vst [vmem:[%s5592_s10 + $0x3c0] sm:$0xff] %v3894_v30 }
 0x395   :  { %2691 = vst [vmem:[%s5592_s10 + $0x3c8] sm:$0xff] %v3896_v5  ;;  %3901 = vtanh.f32 %v2256_v26  ;;  %v2355_v37 = vpop.f32.mrf.mxu0  ;;  %v2404_v55 = vpop.f32.mrf.mxu1 }
 0x396   :  { %v3898_v0 = vpop.eup %3897  ;;  %3903 = vtanh.f32 %v2305_v6  ;;  %v2356_v3 = vadd.f32 %v2355_v37, %v5295_v45  ;;  %v2405_v60 = vadd.f32 %v2404_v55, %v5298_v41 }
 0x397   :  { %v3900_v43 = vpop.eup %3899  ;;  %2576 = vst [vmem:[%s5592_s10 + $0x30] sm:$0xff] %v3898_v0 }
 0x398   :  { %2577 = vst [vmem:[%s5592_s10 + $0x38] sm:$0xff] %v3900_v43  ;;  %3905 = vtanh.f32 %v2356_v3 }
 0x399   :  { %3907 = vtanh.f32 %v2405_v60 }
 0x39a   :  { %v2257_v19 = vpop.f32.mrf.mxu2  ;;  %v2306_v7 = vpop.f32.mrf.mxu3 }
 0x39b   :  { %v3902_v1 = vpop.eup %3901  ;;  %v2258_v54 = vadd.f32 %v2257_v19, %v5314_v2  ;;  %v2307_v14 = vadd.f32 %v2306_v7, %v5317_v58 }
 0x39c   :  { %v3904_v11 = vpop.eup %3903  ;;  %2574 = vst [vmem:[%s5592_s10 + $0x20] sm:$0xff] %v3902_v1 }
 0x39d   :  { %2575 = vst [vmem:[%s5592_s10 + $0x28] sm:$0xff] %v3904_v11  ;;  %3909 = vtanh.f32 %v2258_v54  ;;  %v2358_v28 = vpop.f32.mrf.mxu0  ;;  %v2407_v13 = vpop.f32.mrf.mxu1 }
 0x39e   :  { %v3906_v9 = vpop.eup %3905  ;;  %3911 = vtanh.f32 %v2307_v14  ;;  %v2359_v36 = vadd.f32 %v2358_v28, %v5295_v45  ;;  %v2408_v42 = vadd.f32 %v2407_v13, %v5298_v41 }
 0x39f   :  { %v3908_v40 = vpop.eup %3907  ;;  %2584 = vst [vmem:[%s5592_s10 + $0x70] sm:$0xff] %v3906_v9 }
 0x3a0   :  { %2585 = vst [vmem:[%s5592_s10 + $0x78] sm:$0xff] %v3908_v40  ;;  %3913 = vtanh.f32 %v2359_v36 }
 0x3a1   :  { %3915 = vtanh.f32 %v2408_v42 }
 0x3a2   :  { %v2260_v61 = vpop.f32.mrf.mxu2  ;;  %v2309_v27 = vpop.f32.mrf.mxu3 }
 0x3a3   :  { %v3910_v44 = vpop.eup %3909  ;;  %v2261_v20 = vadd.f32 %v2260_v61, %v5314_v2  ;;  %v2310_v16 = vadd.f32 %v2309_v27, %v5317_v58 }
 0x3a4   :  { %v3912_v62 = vpop.eup %3911  ;;  %2582 = vst [vmem:[%s5592_s10 + $0x60] sm:$0xff] %v3910_v44 }
 0x3a5   :  { %2583 = vst [vmem:[%s5592_s10 + $0x68] sm:$0xff] %v3912_v62  ;;  %3917 = vtanh.f32 %v2261_v20  ;;  %v2360_v18 = vpop.f32.mrf.mxu0  ;;  %v2409_v21 = vpop.f32.mrf.mxu1 }
 0x3a6   :  { %v3914_v29 = vpop.eup %3913  ;;  %3919 = vtanh.f32 %v2310_v16  ;;  %v2361_v25 = vadd.f32 %v2360_v18, %v5295_v45  ;;  %v2410_v31 = vadd.f32 %v2409_v21, %v5298_v41 }
 0x3a7   :  { %v3916_v32 = vpop.eup %3915  ;;  %2592 = vst [vmem:[%s5592_s10 + $0xb0] sm:$0xff] %v3914_v29 }
 0x3a8   :  { %2593 = vst [vmem:[%s5592_s10 + $0xb8] sm:$0xff] %v3916_v32  ;;  %3921 = vtanh.f32 %v2361_v25 }
 0x3a9   :  { %3923 = vtanh.f32 %v2410_v31 }
 0x3aa   :  { %v2262_v38 = vpop.f32.mrf.mxu2  ;;  %v2311_v15 = vpop.f32.mrf.mxu3 }
 0x3ab   :  { %v3918_v56 = vpop.eup %3917  ;;  %v2263_v33 = vadd.f32 %v2262_v38, %v5314_v2  ;;  %v2312_v4 = vadd.f32 %v2311_v15, %v5317_v58 }
 0x3ac   :  { %v3920_v46 = vpop.eup %3919  ;;  %2590 = vst [vmem:[%s5592_s10 + $0xa0] sm:$0xff] %v3918_v56 }
 0x3ad   :  { %2591 = vst [vmem:[%s5592_s10 + $0xa8] sm:$0xff] %v3920_v46  ;;  %3925 = vtanh.f32 %v2263_v33  ;;  %v2363_v51 = vpop.f32.mrf.mxu0  ;;  %v2412_v22 = vpop.f32.mrf.mxu1 }
 0x3ae   :  { %v3922_v35 = vpop.eup %3921  ;;  %3927 = vtanh.f32 %v2312_v4  ;;  %v2364_v47 = vadd.f32 %v2363_v51, %v5295_v45  ;;  %v2413_v23 = vadd.f32 %v2412_v22, %v5298_v41 }
 0x3af   :  { %v3924_v53 = vpop.eup %3923  ;;  %2600 = vst [vmem:[%s5592_s10 + $0xf0] sm:$0xff] %v3922_v35 }
 0x3b0   :  { %2601 = vst [vmem:[%s5592_s10 + $0xf8] sm:$0xff] %v3924_v53  ;;  %3929 = vtanh.f32 %v2364_v47 }
 0x3b1   :  { %3931 = vtanh.f32 %v2413_v23 }
 0x3b2   :  { %v2265_v10 = vpop.f32.mrf.mxu2  ;;  %v2314_v24 = vpop.f32.mrf.mxu3 }
 0x3b3   :  { %v3926_v12 = vpop.eup %3925  ;;  %v2266_v34 = vadd.f32 %v2265_v10, %v5314_v2  ;;  %v2315_v39 = vadd.f32 %v2314_v24, %v5317_v58 }
 0x3b4   :  { %v3928_v48 = vpop.eup %3927  ;;  %2598 = vst [vmem:[%s5592_s10 + $0xe0] sm:$0xff] %v3926_v12 }
 0x3b5   :  { %2599 = vst [vmem:[%s5592_s10 + $0xe8] sm:$0xff] %v3928_v48  ;;  %3933 = vtanh.f32 %v2266_v34  ;;  %v2365_v63 = vpop.f32.mrf.mxu0  ;;  %v2414_v52 = vpop.f32.mrf.mxu1 }
 0x3b6   :  { %v3930_v50 = vpop.eup %3929  ;;  %3935 = vtanh.f32 %v2315_v39  ;;  %v2366_v8 = vadd.f32 %v2365_v63, %v5295_v45  ;;  %v2415_v49 = vadd.f32 %v2414_v52, %v5298_v41 }
 0x3b7   :  { %v3932_v57 = vpop.eup %3931  ;;  %2608 = vst [vmem:[%s5592_s10 + $0x130] sm:$0xff] %v3930_v50 }
 0x3b8   :  { %2609 = vst [vmem:[%s5592_s10 + $0x138] sm:$0xff] %v3932_v57  ;;  %3937 = vtanh.f32 %v2366_v8 }
 0x3b9   :  { %3939 = vtanh.f32 %v2415_v49 }
 0x3ba   :  { %v2267_v17 = vpop.f32.mrf.mxu2  ;;  %v2316_v59 = vpop.f32.mrf.mxu3 }
 0x3bb   :  { %v3934_v30 = vpop.eup %3933  ;;  %v2268_v26 = vadd.f32 %v2267_v17, %v5314_v2  ;;  %v2317_v6 = vadd.f32 %v2316_v59, %v5317_v58 }
 0x3bc   :  { %v3936_v5 = vpop.eup %3935  ;;  %2606 = vst [vmem:[%s5592_s10 + $0x120] sm:$0xff] %v3934_v30 }
 0x3bd   :  { %2607 = vst [vmem:[%s5592_s10 + $0x128] sm:$0xff] %v3936_v5  ;;  %3941 = vtanh.f32 %v2268_v26  ;;  %v2368_v37 = vpop.f32.mrf.mxu0  ;;  %v2417_v55 = vpop.f32.mrf.mxu1 }
 0x3be   :  { %v3938_v0 = vpop.eup %3937  ;;  %3943 = vtanh.f32 %v2317_v6  ;;  %v2369_v3 = vadd.f32 %v2368_v37, %v5295_v45  ;;  %v2418_v60 = vadd.f32 %v2417_v55, %v5298_v41 }
 0x3bf   :  { %v3940_v43 = vpop.eup %3939  ;;  %2616 = vst [vmem:[%s5592_s10 + $0x170] sm:$0xff] %v3938_v0 }
 0x3c0   :  { %2617 = vst [vmem:[%s5592_s10 + $0x178] sm:$0xff] %v3940_v43  ;;  %3945 = vtanh.f32 %v2369_v3 }
 0x3c1   :  { %3947 = vtanh.f32 %v2418_v60 }
 0x3c2   :  { %v2270_v19 = vpop.f32.mrf.mxu2  ;;  %v2319_v7 = vpop.f32.mrf.mxu3 }
 0x3c3   :  { %v3942_v1 = vpop.eup %3941  ;;  %v2271_v54 = vadd.f32 %v2270_v19, %v5314_v2  ;;  %v2320_v14 = vadd.f32 %v2319_v7, %v5317_v58 }
 0x3c4   :  { %v3944_v11 = vpop.eup %3943  ;;  %2614 = vst [vmem:[%s5592_s10 + $0x160] sm:$0xff] %v3942_v1 }
 0x3c5   :  { %2615 = vst [vmem:[%s5592_s10 + $0x168] sm:$0xff] %v3944_v11  ;;  %3949 = vtanh.f32 %v2271_v54  ;;  %v2370_v28 = vpop.f32.mrf.mxu0  ;;  %v2419_v13 = vpop.f32.mrf.mxu1 }
 0x3c6   :  { %v3946_v9 = vpop.eup %3945  ;;  %3951 = vtanh.f32 %v2320_v14  ;;  %v2371_v36 = vadd.f32 %v2370_v28, %v5295_v45  ;;  %v2420_v42 = vadd.f32 %v2419_v13, %v5298_v41 }
 0x3c7   :  { %v3948_v40 = vpop.eup %3947  ;;  %2624 = vst [vmem:[%s5592_s10 + $0x1b0] sm:$0xff] %v3946_v9 }
 0x3c8   :  { %2625 = vst [vmem:[%s5592_s10 + $0x1b8] sm:$0xff] %v3948_v40  ;;  %3953 = vtanh.f32 %v2371_v36 }
 0x3c9   :  { %3955 = vtanh.f32 %v2420_v42 }
 0x3ca   :  { %v2272_v61 = vpop.f32.mrf.mxu2  ;;  %v2321_v27 = vpop.f32.mrf.mxu3 }
 0x3cb   :  { %v3950_v44 = vpop.eup %3949  ;;  %v2273_v20 = vadd.f32 %v2272_v61, %v5314_v2  ;;  %v2322_v16 = vadd.f32 %v2321_v27, %v5317_v58 }
 0x3cc   :  { %v3952_v62 = vpop.eup %3951  ;;  %2622 = vst [vmem:[%s5592_s10 + $0x1a0] sm:$0xff] %v3950_v44 }
 0x3cd   :  { %2623 = vst [vmem:[%s5592_s10 + $0x1a8] sm:$0xff] %v3952_v62  ;;  %3957 = vtanh.f32 %v2273_v20  ;;  %v2373_v18 = vpop.f32.mrf.mxu0  ;;  %v2422_v21 = vpop.f32.mrf.mxu1 }
 0x3ce   :  { %v3954_v29 = vpop.eup %3953  ;;  %3959 = vtanh.f32 %v2322_v16  ;;  %v2374_v25 = vadd.f32 %v2373_v18, %v5295_v45  ;;  %v2423_v31 = vadd.f32 %v2422_v21, %v5298_v41 }
 0x3cf   :  { %v3956_v32 = vpop.eup %3955  ;;  %2632 = vst [vmem:[%s5592_s10 + $0x1f0] sm:$0xff] %v3954_v29 }
 0x3d0   :  { %2633 = vst [vmem:[%s5592_s10 + $0x1f8] sm:$0xff] %v3956_v32  ;;  %3961 = vtanh.f32 %v2374_v25 }
 0x3d1   :  { %3963 = vtanh.f32 %v2423_v31 }
 0x3d2   :  { %v2275_v38 = vpop.f32.mrf.mxu2  ;;  %v2324_v15 = vpop.f32.mrf.mxu3 }
 0x3d3   :  { %v3958_v56 = vpop.eup %3957  ;;  %v2276_v33 = vadd.f32 %v2275_v38, %v5314_v2  ;;  %v2325_v4 = vadd.f32 %v2324_v15, %v5317_v58 }
 0x3d4   :  { %v3960_v46 = vpop.eup %3959  ;;  %2630 = vst [vmem:[%s5592_s10 + $0x1e0] sm:$0xff] %v3958_v56 }
 0x3d5   :  { %2631 = vst [vmem:[%s5592_s10 + $0x1e8] sm:$0xff] %v3960_v46  ;;  %3965 = vtanh.f32 %v2276_v33  ;;  %v2375_v51 = vpop.f32.mrf.mxu0  ;;  %v2424_v22 = vpop.f32.mrf.mxu1 }
 0x3d6   :  { %v3962_v35 = vpop.eup %3961  ;;  %3967 = vtanh.f32 %v2325_v4  ;;  %v2376_v47 = vadd.f32 %v2375_v51, %v5295_v45  ;;  %v2425_v23 = vadd.f32 %v2424_v22, %v5298_v41 }
 0x3d7   :  { %v3964_v53 = vpop.eup %3963  ;;  %2640 = vst [vmem:[%s5592_s10 + $0x230] sm:$0xff] %v3962_v35 }
 0x3d8   :  { %2641 = vst [vmem:[%s5592_s10 + $0x238] sm:$0xff] %v3964_v53  ;;  %3969 = vtanh.f32 %v2376_v47 }
 0x3d9   :  { %3971 = vtanh.f32 %v2425_v23 }
 0x3da   :  { %v2277_v10 = vpop.f32.mrf.mxu2  ;;  %v2326_v24 = vpop.f32.mrf.mxu3 }
 0x3db   :  { %v3966_v12 = vpop.eup %3965  ;;  %v2278_v34 = vadd.f32 %v2277_v10, %v5314_v2  ;;  %v2327_v39 = vadd.f32 %v2326_v24, %v5317_v58 }
 0x3dc   :  { %v3968_v48 = vpop.eup %3967  ;;  %2638 = vst [vmem:[%s5592_s10 + $0x220] sm:$0xff] %v3966_v12 }
 0x3dd   :  { %2639 = vst [vmem:[%s5592_s10 + $0x228] sm:$0xff] %v3968_v48  ;;  %3973 = vtanh.f32 %v2278_v34  ;;  %v2378_v63 = vpop.f32.mrf.mxu0  ;;  %v2427_v52 = vpop.f32.mrf.mxu1 }
 0x3de   :  { %v3970_v50 = vpop.eup %3969  ;;  %3975 = vtanh.f32 %v2327_v39  ;;  %v2379_v8 = vadd.f32 %v2378_v63, %v5295_v45  ;;  %v2428_v49 = vadd.f32 %v2427_v52, %v5298_v41 }
 0x3df   :  { %v3972_v57 = vpop.eup %3971  ;;  %2648 = vst [vmem:[%s5592_s10 + $0x270] sm:$0xff] %v3970_v50 }
 0x3e0   :  { %2649 = vst [vmem:[%s5592_s10 + $0x278] sm:$0xff] %v3972_v57  ;;  %3977 = vtanh.f32 %v2379_v8 }
 0x3e1   :  { %3979 = vtanh.f32 %v2428_v49 }
 0x3e2   :  { %v2280_v17 = vpop.f32.mrf.mxu2  ;;  %v2329_v59 = vpop.f32.mrf.mxu3 }
 0x3e3   :  { %v3974_v30 = vpop.eup %3973  ;;  %v2281_v26 = vadd.f32 %v2280_v17, %v5314_v2  ;;  %v2330_v6 = vadd.f32 %v2329_v59, %v5317_v58 }
 0x3e4   :  { %v3976_v5 = vpop.eup %3975  ;;  %2646 = vst [vmem:[%s5592_s10 + $0x260] sm:$0xff] %v3974_v30 }
 0x3e5   :  { %2647 = vst [vmem:[%s5592_s10 + $0x268] sm:$0xff] %v3976_v5  ;;  %3981 = vtanh.f32 %v2281_v26  ;;  %v2380_v37 = vpop.f32.mrf.mxu0  ;;  %v2429_v55 = vpop.f32.mrf.mxu1 }
 0x3e6   :  { %v3978_v0 = vpop.eup %3977  ;;  %3983 = vtanh.f32 %v2330_v6  ;;  %v2381_v3 = vadd.f32 %v2380_v37, %v5295_v45  ;;  %v2430_v60 = vadd.f32 %v2429_v55, %v5298_v41 }
 0x3e7   :  { %v3980_v43 = vpop.eup %3979  ;;  %2656 = vst [vmem:[%s5592_s10 + $0x2b0] sm:$0xff] %v3978_v0 }
 0x3e8   :  { %2657 = vst [vmem:[%s5592_s10 + $0x2b8] sm:$0xff] %v3980_v43  ;;  %3985 = vtanh.f32 %v2381_v3 }
 0x3e9   :  { %3987 = vtanh.f32 %v2430_v60 }
 0x3ea   :  { %v2282_v19 = vpop.f32.mrf.mxu2  ;;  %v2331_v7 = vpop.f32.mrf.mxu3 }
 0x3eb   :  { %v3982_v1 = vpop.eup %3981  ;;  %v2283_v54 = vadd.f32 %v2282_v19, %v5314_v2  ;;  %v2332_v14 = vadd.f32 %v2331_v7, %v5317_v58 }
 0x3ec   :  { %v3984_v11 = vpop.eup %3983  ;;  %2654 = vst [vmem:[%s5592_s10 + $0x2a0] sm:$0xff] %v3982_v1 }
 0x3ed   :  { %2655 = vst [vmem:[%s5592_s10 + $0x2a8] sm:$0xff] %v3984_v11  ;;  %3989 = vtanh.f32 %v2283_v54  ;;  %v2383_v28 = vpop.f32.mrf.mxu0  ;;  %v2432_v13 = vpop.f32.mrf.mxu1 }
 0x3ee   :  { %v3986_v9 = vpop.eup %3985  ;;  %3991 = vtanh.f32 %v2332_v14  ;;  %v2384_v36 = vadd.f32 %v2383_v28, %v5295_v45  ;;  %v2433_v42 = vadd.f32 %v2432_v13, %v5298_v41 }
 0x3ef   :  { %v3988_v40 = vpop.eup %3987  ;;  %2664 = vst [vmem:[%s5592_s10 + $0x2f0] sm:$0xff] %v3986_v9 }
 0x3f0   :  { %2665 = vst [vmem:[%s5592_s10 + $0x2f8] sm:$0xff] %v3988_v40  ;;  %3993 = vtanh.f32 %v2384_v36 }
 0x3f1   :  { %3995 = vtanh.f32 %v2433_v42 }
 0x3f2   :  { %v2285_v61 = vpop.f32.mrf.mxu2  ;;  %v2334_v27 = vpop.f32.mrf.mxu3 }
 0x3f3   :  { %v3990_v44 = vpop.eup %3989  ;;  %v2286_v20 = vadd.f32 %v2285_v61, %v5314_v2  ;;  %v2335_v16 = vadd.f32 %v2334_v27, %v5317_v58 }
 0x3f4   :  { %v3992_v62 = vpop.eup %3991  ;;  %2662 = vst [vmem:[%s5592_s10 + $0x2e0] sm:$0xff] %v3990_v44 }
 0x3f5   :  { %2663 = vst [vmem:[%s5592_s10 + $0x2e8] sm:$0xff] %v3992_v62  ;;  %3997 = vtanh.f32 %v2286_v20  ;;  %v2385_v18 = vpop.f32.mrf.mxu0  ;;  %v2434_v21 = vpop.f32.mrf.mxu1 }
 0x3f6   :  { %v3994_v29 = vpop.eup %3993  ;;  %3999 = vtanh.f32 %v2335_v16  ;;  %v2386_v25 = vadd.f32 %v2385_v18, %v5295_v45  ;;  %v2435_v31 = vadd.f32 %v2434_v21, %v5298_v41 }
 0x3f7   :  { %v3996_v32 = vpop.eup %3995  ;;  %2672 = vst [vmem:[%s5592_s10 + $0x330] sm:$0xff] %v3994_v29 }
 0x3f8   :  { %2673 = vst [vmem:[%s5592_s10 + $0x338] sm:$0xff] %v3996_v32  ;;  %4001 = vtanh.f32 %v2386_v25 }
 0x3f9   :  { %4003 = vtanh.f32 %v2435_v31 }
 0x3fa   :  { %v2287_v38 = vpop.f32.mrf.mxu2  ;;  %v2336_v15 = vpop.f32.mrf.mxu3 }
 0x3fb   :  { %v3998_v56 = vpop.eup %3997  ;;  %v2288_v33 = vadd.f32 %v2287_v38, %v5314_v2  ;;  %v2337_v4 = vadd.f32 %v2336_v15, %v5317_v58 }
 0x3fc   :  { %v4000_v46 = vpop.eup %3999  ;;  %2670 = vst [vmem:[%s5592_s10 + $0x320] sm:$0xff] %v3998_v56 }
 0x3fd   :  { %2671 = vst [vmem:[%s5592_s10 + $0x328] sm:$0xff] %v4000_v46  ;;  %4005 = vtanh.f32 %v2288_v33  ;;  %v2388_v51 = vpop.f32.mrf.mxu0  ;;  %v2437_v22 = vpop.f32.mrf.mxu1 }
 0x3fe   :  { %v4002_v35 = vpop.eup %4001  ;;  %4007 = vtanh.f32 %v2337_v4  ;;  %v2389_v47 = vadd.f32 %v2388_v51, %v5295_v45  ;;  %v2438_v23 = vadd.f32 %v2437_v22, %v5298_v41 }
 0x3ff   :  { %v4004_v53 = vpop.eup %4003  ;;  %2680 = vst [vmem:[%s5592_s10 + $0x370] sm:$0xff] %v4002_v35 }
 0x400   :  { %2681 = vst [vmem:[%s5592_s10 + $0x378] sm:$0xff] %v4004_v53  ;;  %4009 = vtanh.f32 %v2389_v47 }
 0x401   :  { %4011 = vtanh.f32 %v2438_v23 }
 0x402   :  { %v2290_v10 = vpop.f32.mrf.mxu2  ;;  %v2339_v24 = vpop.f32.mrf.mxu3 }
 0x403   :  { %v4006_v12 = vpop.eup %4005  ;;  %v2291_v34 = vadd.f32 %v2290_v10, %v5314_v2  ;;  %v2340_v39 = vadd.f32 %v2339_v24, %v5317_v58 }
 0x404   :  { %v4008_v48 = vpop.eup %4007  ;;  %2678 = vst [vmem:[%s5592_s10 + $0x360] sm:$0xff] %v4006_v12 }
 0x405   :  { %2679 = vst [vmem:[%s5592_s10 + $0x368] sm:$0xff] %v4008_v48  ;;  %4013 = vtanh.f32 %v2291_v34  ;;  %v2390_v63 = vpop.f32.mrf.mxu0  ;;  %v2439_v52 = vpop.f32.mrf.mxu1 }
 0x406   :  { %v4010_v50 = vpop.eup %4009  ;;  %4015 = vtanh.f32 %v2340_v39  ;;  %v2391_v8 = vadd.f32 %v2390_v63, %v5295_v45  ;;  %v2440_v49 = vadd.f32 %v2439_v52, %v5298_v41 }
 0x407   :  { %v4012_v57 = vpop.eup %4011  ;;  %2688 = vst [vmem:[%s5592_s10 + $0x3b0] sm:$0xff] %v4010_v50 }
 0x408   :  { %2689 = vst [vmem:[%s5592_s10 + $0x3b8] sm:$0xff] %v4012_v57  ;;  %4017 = vtanh.f32 %v2391_v8 }
 0x409   :  { %4019 = vtanh.f32 %v2440_v49 }
 0x40a   :  { %v2292_v17 = vpop.f32.mrf.mxu2  ;;  %v2341_v59 = vpop.f32.mrf.mxu3 }
 0x40b   :  { %v4014_v30 = vpop.eup %4013  ;;  %v2293_v26 = vadd.f32 %v2292_v17, %v5314_v2  ;;  %v2342_v45 = vadd.f32 %v2341_v59, %v5317_v58 }
 0x40c   :  { %v4016_v6 = vpop.eup %4015  ;;  %2686 = vst [vmem:[%s5592_s10 + $0x3a0] sm:$0xff] %v4014_v30 }
 0x40d   :  { %2687 = vst [vmem:[%s5592_s10 + $0x3a8] sm:$0xff] %v4016_v6  ;;  %4021 = vtanh.f32 %v2293_v26 }
 0x40e   :  { %v4018_v41 = vpop.eup %4017  ;;  %4023 = vtanh.f32 %v2342_v45 }
 0x40f   :  { %v4020_v5 = vpop.eup %4019  ;;  %2696 = vst [vmem:[%s5592_s10 + $0x3f0] sm:$0xff] %v4018_v41 }
 0x410   :  { %2697 = vst [vmem:[%s5592_s10 + $0x3f8] sm:$0xff] %v4020_v5 }
 0x413   :  { %v4022_v2 = vpop.eup %4021 }
 0x414   :  { %v4024_v58 = vpop.eup %4023  ;;  %2694 = vst [vmem:[%s5592_s10 + $0x3e0] sm:$0xff] %v4022_v2 }
 0x415   :  { %2695 = vst [vmem:[%s5592_s10 + $0x3e8] sm:$0xff] %v4024_v58 }
 0x416   :  { %2706 = vsyncpa [#allocation3], 1 }

</bundles_post_ra>
